<compile_context>
chip_gen: v5e
topology: v5e:2x2
jax: 0.10.0
libtpu: 0.0.40
codegen_flags: <defaults>
</compile_context>

<pallas_src>
import functools

import jax
import jax.numpy as jnp
from jax.experimental import pallas as pl
from jax.experimental.pallas import tpu as pltpu


def _resblock_kernel(x_ref, mask_ref,
                     wqkv_ref, bqkv_ref, wo_ref, bo_ref,
                     g1_ref, b1_ref, g2_ref, b2_ref,
                     wfc_ref, bfc_ref, wpr_ref, bpr_ref,
                     y_ref, p_ref, probs_acc,
                     *, num_heads, mlp_chunk):
    f32 = jnp.float32
    bf16 = jnp.bfloat16

    x = x_ref[...]                              # (Bt, L, D) f32, L % 8 == 0
    Bt, L, D = x.shape
    H = num_heads
    hd = D // H
    M = Bt * L
    eps = 1e-5

    def layernorm(v, g_ref, b_ref):             # f32 elementwise (VPU/EUP)
        mu = jnp.mean(v, axis=-1, keepdims=True)
        c = v - mu
        var = jnp.mean(c * c, axis=-1, keepdims=True)
        return c * jax.lax.rsqrt(var + eps) * g_ref[...] + b_ref[...]

    x2d = x.reshape(M, D)                       # free: L padded to sublane multiple

    # ---- ln_1 + fused QKV projection (bf16 matmul, f32 accumulate) ----
    xn = layernorm(x2d, g1_ref, b1_ref)
    qkv = jnp.dot(xn.astype(bf16), wqkv_ref[...],
                  preferred_element_type=f32) + bqkv_ref[...]   # (M, 3D)
    qkv3 = qkv.reshape(Bt, L, 3 * D)

    # ---- multi-head attention ----
    probs_acc[...] = jnp.zeros_like(probs_acc)           # fresh per grid step
    mask_b = jnp.broadcast_to(mask_ref[...], (Bt, L, L))  # hoisted: one broadcast

    attn_acc = jnp.zeros((M, D), f32)           # single (M, D) accumulator
    for h in range(H):                          # static loop, H small
        lo = h * hd
        qh = qkv3[:, :, lo:lo + hd].astype(bf16)            # 1/sqrt(hd) folded in wq
        kh = qkv3[:, :, D + lo:D + lo + hd].astype(bf16)
        vh = qkv3[:, :, 2 * D + lo:2 * D + lo + hd].astype(bf16)

        s = jnp.einsum('bld,bmd->blm', qh, kh,
                       preferred_element_type=f32) + mask_b   # (Bt, L, L) f32
        s = s - jnp.max(s, axis=-1, keepdims=True)
        e = jnp.exp(s)
        # exact reciprocal so the exported probs sum to 1 (value path shares it;
        # the reciprocal input is only (Bt, L, 1), so the cost is negligible).
        p = e * pl.reciprocal(jnp.sum(e, axis=-1, keepdims=True), approx=False)
        probs_acc[:, :, :L] += p                # scratch accumulate (no live carry)

        ho = jnp.einsum('blm,bmd->bld', p.astype(bf16), vh,
                        preferred_element_type=f32)           # (Bt, L, hd)
        # folded output projection: o @ Wo^T == sum_h O_h @ Wo^T[rows of head h]
        attn_acc = attn_acc + jnp.dot(
            ho.reshape(M, hd).astype(bf16), wo_ref[lo:lo + hd, :],
            preferred_element_type=f32)

    x1 = x2d + attn_acc + bo_ref[...]           # first residual (f32)

    # ---- ln_2 + MLP (c_fc -> QuickGELU -> c_proj), hidden dim chunked ----
    xn2 = layernorm(x1, g2_ref, b2_ref).astype(bf16)
    bfc = bfc_ref[...]                          # (1, 4D)
    mlp = jnp.zeros((M, D), f32)
    for c0 in range(0, 4 * D, mlp_chunk):       # 128-aligned static chunks
        hmid = jnp.dot(xn2, wfc_ref[:, c0:c0 + mlp_chunk],
                       preferred_element_type=f32) + bfc[:, c0:c0 + mlp_chunk]
        hmid = hmid * jax.nn.sigmoid(1.702 * hmid)           # QuickGELU (f32)
        mlp = mlp + jnp.dot(hmid.astype(bf16), wpr_ref[c0:c0 + mlp_chunk, :],
                            preferred_element_type=f32)

    y_ref[...] = (x1 + mlp + bpr_ref[...]).reshape(Bt, L, D)  # second residual
    p_ref[...] = probs_acc[...] * (1.0 / H)     # lane-dense (Lp) unmasked store


def _round_up(x, m):
    return ((x + m - 1) // m) * m


def _pick_batch_tile(n, max_tile):
    for bt in range(min(n, max_tile), 0, -1):
        if n % bt == 0:
            return bt
    return 1


def _pick_mlp_chunk(dh, target=1024):
    """Largest multiple of 128 dividing dh and <= target; else dh (single chunk)."""
    c = (min(dh, target) // 128) * 128
    while c >= 128:
        if dh % c == 0:
            return c
        c -= 128
    return dh


def exposed_resblock_forward(x_lnd, params, attn_mask, num_heads, batch_tile=None):
    L, N, D = x_lnd.shape
    H = num_heads
    hd = D // H
    f32, bf16 = jnp.float32, jnp.bfloat16

    # Pad seq len to a sublane multiple (CLIP L=77 -> 80) so in-kernel reshapes
    # are layout-free; padded keys are masked out, padded rows sliced off below.
    L8 = _round_up(L, 8)
    Lp = _round_up(L8, 128)                     # lane-dense probs last dim

    x_nld = jnp.transpose(x_lnd, (1, 0, 2)).astype(f32)
    mask = attn_mask.astype(f32)
    if L8 != L:
        x_nld = jnp.pad(x_nld, ((0, 0), (0, L8 - L), (0, 0)))
        mask = jnp.pad(mask, ((0, L8 - L), (0, L8 - L)))
        mask = mask.at[:L, L:].set(-jnp.inf)    # real queries ignore padded keys
        # padded query rows stay fully unmasked -> no all -inf row -> no NaN

    # ---- per-generation VMEM budget and batch-tile cap ----
    try:
        vmem_cap = pltpu.get_tpu_info().vmem_capacity_bytes
    except Exception:
        vmem_cap = 64 * 1024 * 1024             # conservative (v7x-sized) fallback
    vmem_limit = int(vmem_cap * 0.8)            # leave headroom for Mosaic scratch
    max_bt = 8 if vmem_cap >= 96 * 1024 * 1024 else 4
    Bt = _pick_batch_tile(N, max_bt) if batch_tile is None else batch_tile
    assert N % Bt == 0

    mlp_chunk = _pick_mlp_chunk(4 * D)

    # ---- one-time (XLA-side) parameter packing: fuse QKV, pre-transpose,
    #      fold 1/sqrt(hd) into q, cast matmul weights to bf16 ----
    scale = 1.0 / (hd ** 0.5)
    wqkv_t = jnp.concatenate(
        [params["wq"] * scale, params["wk"], params["wv"]], axis=0).T.astype(bf16)
    bqkv = jnp.concatenate(
        [params["bq"] * scale, params["bk"], params["bv"]]).reshape(1, -1).astype(f32)
    wo_t = params["wo"].T.astype(bf16)          # (D, D)
    wfc_t = params["wfc"].T.astype(bf16)        # (D, 4D)
    wpr_t = params["wpr"].T.astype(bf16)        # (4D, D)

    def row(v):                                 # 1-D params -> (1, X)
        return v.reshape(1, -1).astype(f32)

    inputs = (
        x_nld, mask,
        wqkv_t, bqkv, wo_t, row(params["bo"]),
        row(params["g1"]), row(params["b1"]),
        row(params["g2"]), row(params["b2"]),
        wfc_t, row(params["bfc"]), wpr_t, row(params["bpr"]),
    )

    # Grid-invariant operands: whole array resident in VMEM once (no per-step
    # double buffering, no re-DMA across the batch grid).
    in_specs = [pl.BlockSpec((Bt, L8, D), lambda n: (n, 0, 0))]
    in_specs += [pl.BlockSpec(memory_space=pltpu.MemorySpace.VMEM)
                 for _ in inputs[1:]]
    out_specs = [pl.BlockSpec((Bt, L8, D), lambda n: (n, 0, 0)),
                 pl.BlockSpec((Bt, L8, Lp), lambda n: (n, 0, 0))]

    y_nld, probs = pl.pallas_call(
        functools.partial(_resblock_kernel, num_heads=H, mlp_chunk=mlp_chunk),
        out_shape=(jax.ShapeDtypeStruct((N, L8, D), f32),
                   jax.ShapeDtypeStruct((N, L8, Lp), f32)),
        grid_spec=pltpu.PrefetchScalarGridSpec(
            num_scalar_prefetch=0,
            grid=(N // Bt,),
            in_specs=in_specs,
            out_specs=out_specs,
            scratch_shapes=[pltpu.VMEM((Bt, L8, Lp), f32)]),
        compiler_params=pltpu.CompilerParams(
            dimension_semantics=("parallel",),
            vmem_limit_bytes=vmem_limit),
    )(*inputs)

    y = jnp.transpose(y_nld, (1, 0, 2))[:L]     # drop padded rows
    return y, probs[:, :L, :L]


def _reference(x_lnd, p, mask, H):
    """Pure-JAX (f32) reference of the PyTorch forward (eval mode)."""
    L, N, D = x_lnd.shape
    hd = D // H

    def ln(v, g, b):
        mu = v.mean(-1, keepdims=True)
        var = ((v - mu) ** 2).mean(-1, keepdims=True)
        return (v - mu) / jnp.sqrt(var + 1e-5) * g + b

    x = jnp.transpose(x_lnd, (1, 0, 2))                      # (N, L, D)
    xn = ln(x, p["g1"], p["b1"])
    q = xn @ p["wq"].T + p["bq"]
    k = xn @ p["wk"].T + p["bk"]
    v = xn @ p["wv"].T + p["bv"]
    qh = q.reshape(N, L, H, hd).transpose(0, 2, 1, 3)
    kh = k.reshape(N, L, H, hd).transpose(0, 2, 1, 3)
    vh = v.reshape(N, L, H, hd).transpose(0, 2, 1, 3)
    s = jnp.einsum("nhld,nhmd->nhlm", qh, kh) / jnp.sqrt(hd) + mask
    pr = jax.nn.softmax(s, axis=-1)
    o = jnp.einsum("nhlm,nhmd->nhld", pr, vh).transpose(0, 2, 1, 3).reshape(N, L, D)
    o = o @ p["wo"].T + p["bo"]
    x1 = x + o
    xn2 = ln(x1, p["g2"], p["b2"])
    h = xn2 @ p["wfc"].T + p["bfc"]
    h = h * jax.nn.sigmoid(1.702 * h)
    y = x1 + h @ p["wpr"].T + p["bpr"]
    return jnp.transpose(y, (1, 0, 2)), pr.mean(axis=1)


if __name__ == "__main__":
    def run_case(L, N, D, H):
        key = jax.random.PRNGKey(0)
        ks = jax.random.split(key, 13)

        def init(k, shape, s=0.05):
            return jax.random.normal(k, shape, jnp.float32) * s

        params = dict(
            wq=init(ks[0], (D, D)), wk=init(ks[1], (D, D)), wv=init(ks[2], (D, D)),
            bq=init(ks[3], (D,)), bk=init(ks[4], (D,)), bv=init(ks[5], (D,)),
            wo=init(ks[6], (D, D)), bo=init(ks[7], (D,)),
            g1=jnp.ones((D,), jnp.float32), b1=jnp.zeros((D,), jnp.float32),
            g2=jnp.ones((D,), jnp.float32), b2=jnp.zeros((D,), jnp.float32),
            wfc=init(ks[8], (4 * D, D)), bfc=init(ks[9], (4 * D,)),
            wpr=init(ks[10], (D, 4 * D)), bpr=init(ks[11], (D,)),
        )
        x = jax.random.normal(ks[12], (L, N, D), jnp.float32)

        # CLIP-style causal attention mask: -inf strictly above the diagonal.
        i = jnp.arange(L)[:, None]
        j = jnp.arange(L)[None, :]
        attn_mask = jnp.where(j > i, -jnp.inf, 0.0).astype(jnp.float32)

        y, probs = exposed_resblock_forward(x, params, attn_mask, H)
        y = jax.block_until_ready(y)
        probs = jax.block_until_ready(probs)

        y_ref, p_ref = _reference(x, params, attn_mask, H)
        assert y.shape == (L, N, D) and probs.shape == (N, L, L)
        assert jnp.allclose(y, y_ref, rtol=2e-3, atol=2e-3)
        assert jnp.allclose(probs, p_ref, rtol=2e-3, atol=2e-3)

    run_case(8, 2, 32, 4)   # sublane-aligned seq len
    run_case(7, 2, 32, 4)   # non-multiple-of-8 seq len (exercises padding path)

    print("KERNEL_OK")
</pallas_src>

<mosaic_0001>
module attributes {stable_mosaic.version = 11 : i64} {
  func.func @_resblock_kernel(%arg0: i32, %arg1: memref<2x8x32xf32, #tpu.memory_space<vmem>>, %arg2: memref<8x8xf32, #tpu.memory_space<vmem>>, %arg3: memref<32x96xbf16, #tpu.memory_space<vmem>>, %arg4: memref<1x96xf32, #tpu.memory_space<vmem>>, %arg5: memref<32x32xbf16, #tpu.memory_space<vmem>>, %arg6: memref<1x32xf32, #tpu.memory_space<vmem>>, %arg7: memref<1x32xf32, #tpu.memory_space<vmem>>, %arg8: memref<1x32xf32, #tpu.memory_space<vmem>>, %arg9: memref<1x32xf32, #tpu.memory_space<vmem>>, %arg10: memref<1x32xf32, #tpu.memory_space<vmem>>, %arg11: memref<32x128xbf16, #tpu.memory_space<vmem>>, %arg12: memref<1x128xf32, #tpu.memory_space<vmem>>, %arg13: memref<128x32xbf16, #tpu.memory_space<vmem>>, %arg14: memref<1x32xf32, #tpu.memory_space<vmem>>, %arg15: memref<2x8x32xf32, #tpu.memory_space<vmem>>, %arg16: memref<2x8x128xf32, #tpu.memory_space<vmem>>, %arg17: memref<2x8x128xf32, #tpu.memory_space<vmem>>) attributes {dimension_semantics = [#tpu.dimension_semantics<parallel>], iteration_bounds = array<i64: 1>, scalar_prefetch = 0 : i64, scratch_operands = 1 : i64, tpu.core_type = #tpu.core_type<tc>, window_params = [{transform_indices = @transform_0, window_bounds = array<i64: 2, 8, 32>}, {pipeline_mode = #tpu.pipeline_mode<synchronous>, transform_indices = @transform_1, window_bounds = array<i64: 8, 8>}, {pipeline_mode = #tpu.pipeline_mode<synchronous>, transform_indices = @transform_2, window_bounds = array<i64: 32, 96>}, {pipeline_mode = #tpu.pipeline_mode<synchronous>, transform_indices = @transform_3, window_bounds = array<i64: 1, 96>}, {pipeline_mode = #tpu.pipeline_mode<synchronous>, transform_indices = @transform_4, window_bounds = array<i64: 32, 32>}, {pipeline_mode = #tpu.pipeline_mode<synchronous>, transform_indices = @transform_5, window_bounds = array<i64: 1, 32>}, {pipeline_mode = #tpu.pipeline_mode<synchronous>, transform_indices = @transform_6, window_bounds = array<i64: 1, 32>}, {pipeline_mode = #tpu.pipeline_mode<synchronous>, transform_indices = @transform_7, window_bounds = array<i64: 1, 32>}, {pipeline_mode = #tpu.pipeline_mode<synchronous>, transform_indices = @transform_8, window_bounds = array<i64: 1, 32>}, {pipeline_mode = #tpu.pipeline_mode<synchronous>, transform_indices = @transform_9, window_bounds = array<i64: 1, 32>}, {pipeline_mode = #tpu.pipeline_mode<synchronous>, transform_indices = @transform_10, window_bounds = array<i64: 32, 128>}, {pipeline_mode = #tpu.pipeline_mode<synchronous>, transform_indices = @transform_11, window_bounds = array<i64: 1, 128>}, {pipeline_mode = #tpu.pipeline_mode<synchronous>, transform_indices = @transform_12, window_bounds = array<i64: 128, 32>}, {pipeline_mode = #tpu.pipeline_mode<synchronous>, transform_indices = @transform_13, window_bounds = array<i64: 1, 32>}, {transform_indices = @transform_14, window_bounds = array<i64: 2, 8, 32>}, {transform_indices = @transform_15, window_bounds = array<i64: 2, 8, 128>}]} {
    %c0 = arith.constant 0 : index
    %c0_0 = arith.constant 0 : index
    %c0_1 = arith.constant 0 : index
    %0 = vector.load %arg1[%c0, %c0_0, %c0_1] : memref<2x8x32xf32, #tpu.memory_space<vmem>>, vector<2x8x32xf32>
    %1 = vector.shape_cast %0 : vector<2x8x32xf32> to vector<16x32xf32>
    %cst = arith.constant dense<0.000000e+00> : vector<16xf32>
    %2 = vector.multi_reduction <add>, %1, %cst [1] : vector<16x32xf32> to vector<16xf32>
    %3 = vector.shape_cast %2 : vector<16xf32> to vector<16x1xf32>
    %cst_2 = arith.constant 3.200000e+01 : f32
    %4 = vector.broadcast %cst_2 : f32 to vector<16x1xf32>
    %5 = arith.divf %3, %4 : vector<16x1xf32>
    %6 = vector.broadcast %5 : vector<16x1xf32> to vector<16x32xf32>
    %7 = arith.subf %1, %6 : vector<16x32xf32>
    %8 = arith.mulf %7, %7 : vector<16x32xf32>
    %cst_3 = arith.constant dense<0.000000e+00> : vector<16xf32>
    %9 = vector.multi_reduction <add>, %8, %cst_3 [1] : vector<16x32xf32> to vector<16xf32>
    %10 = vector.shape_cast %9 : vector<16xf32> to vector<16x1xf32>
    %cst_4 = arith.constant 3.200000e+01 : f32
    %11 = vector.broadcast %cst_4 : f32 to vector<16x1xf32>
    %12 = arith.divf %10, %11 : vector<16x1xf32>
    %cst_5 = arith.constant 9.99999974E-6 : f32
    %13 = vector.broadcast %cst_5 : f32 to vector<16x1xf32>
    %14 = arith.addf %12, %13 : vector<16x1xf32>
    %15 = math.rsqrt %14 : vector<16x1xf32>
    %16 = vector.broadcast %15 : vector<16x1xf32> to vector<16x32xf32>
    %17 = arith.mulf %7, %16 : vector<16x32xf32>
    %c0_6 = arith.constant 0 : index
    %c0_7 = arith.constant 0 : index
    %18 = vector.load %arg7[%c0_6, %c0_7] : memref<1x32xf32, #tpu.memory_space<vmem>>, vector<1x32xf32>
    %19 = vector.broadcast %18 : vector<1x32xf32> to vector<16x32xf32>
    %20 = arith.mulf %17, %19 : vector<16x32xf32>
    %c0_8 = arith.constant 0 : index
    %c0_9 = arith.constant 0 : index
    %21 = vector.load %arg8[%c0_8, %c0_9] : memref<1x32xf32, #tpu.memory_space<vmem>>, vector<1x32xf32>
    %22 = vector.broadcast %21 : vector<1x32xf32> to vector<16x32xf32>
    %23 = arith.addf %20, %22 : vector<16x32xf32>
    %24 = arith.truncf %23 : vector<16x32xf32> to vector<16x32xbf16>
    %c0_10 = arith.constant 0 : index
    %c0_11 = arith.constant 0 : index
    %25 = vector.load %arg3[%c0_10, %c0_11] : memref<32x96xbf16, #tpu.memory_space<vmem>>, vector<32x96xbf16>
    %cst_12 = arith.constant dense<0.000000e+00> : vector<16x96xf32>
    %26 = tpu.matmul %24, %25, %cst_12 {dimension_numbers = #tpu.dot_dimension_numbers<[1], [0], [0], [1], [0, 0, 1, 1], [], []>} : vector<16x32xbf16>, vector<32x96xbf16>, vector<16x96xf32> -> vector<16x96xf32>
    %c0_13 = arith.constant 0 : index
    %c0_14 = arith.constant 0 : index
    %27 = vector.load %arg4[%c0_13, %c0_14] : memref<1x96xf32, #tpu.memory_space<vmem>>, vector<1x96xf32>
    %28 = vector.broadcast %27 : vector<1x96xf32> to vector<16x96xf32>
    %29 = arith.addf %26, %28 : vector<16x96xf32>
    %30 = vector.shape_cast %29 : vector<16x96xf32> to vector<2x8x96xf32>
    %cst_15 = arith.constant 0.000000e+00 : f32
    %31 = vector.broadcast %cst_15 : f32 to vector<2x8x128xf32>
    %c0_16 = arith.constant 0 : index
    %c0_17 = arith.constant 0 : index
    %c0_18 = arith.constant 0 : index
    %32 = vector.load %arg17[%c0_16, %c0_17, %c0_18] : memref<2x8x128xf32, #tpu.memory_space<vmem>>, vector<2x8x128xf32>
    tpu.vector_store %arg17[%c0_16, %c0_17, %c0_18], %31 {strides = array<i32>} : memref<2x8x128xf32, #tpu.memory_space<vmem>>, vector<2x8x128xf32>,
    %c0_19 = arith.constant 0 : index
    %c0_20 = arith.constant 0 : index
    %33 = vector.load %arg2[%c0_19, %c0_20] : memref<8x8xf32, #tpu.memory_space<vmem>>, vector<8x8xf32>
    %34 = vector.shape_cast %33 : vector<8x8xf32> to vector<1x8x8xf32>
    %35 = vector.broadcast %34 : vector<1x8x8xf32> to vector<2x8x8xf32>
    %cst_21 = arith.constant 0.000000e+00 : f32
    %36 = vector.broadcast %cst_21 : f32 to vector<16x32xf32>
    %37 = vector.extract_strided_slice %30 {offsets = [0, 0, 0], sizes = [2, 8, 8], strides = [1, 1, 1]} : vector<2x8x96xf32> to vector<2x8x8xf32>
    %38 = arith.truncf %37 : vector<2x8x8xf32> to vector<2x8x8xbf16>
    %39 = vector.extract_strided_slice %30 {offsets = [0, 0, 32], sizes = [2, 8, 8], strides = [1, 1, 1]} : vector<2x8x96xf32> to vector<2x8x8xf32>
    %40 = arith.truncf %39 : vector<2x8x8xf32> to vector<2x8x8xbf16>
    %41 = vector.extract_strided_slice %30 {offsets = [0, 0, 64], sizes = [2, 8, 8], strides = [1, 1, 1]} : vector<2x8x96xf32> to vector<2x8x8xf32>
    %42 = arith.truncf %41 : vector<2x8x8xf32> to vector<2x8x8xbf16>
    "tpu.trace_start"() <{level = 10 : i32, message = "bld,bmd->blm"}> : () -> ()
    %cst_22 = arith.constant dense<0.000000e+00> : vector<2x8x8xf32>
    %43 = tpu.matmul %38, %40, %cst_22 {dimension_numbers = #tpu.dot_dimension_numbers<[2], [2], [1], [1], [0, 0, 0, 1, 1, 1], [0], [0]>} : vector<2x8x8xbf16>, vector<2x8x8xbf16>, vector<2x8x8xf32> -> vector<2x8x8xf32>
    "tpu.trace_stop"() : () -> ()
    %44 = arith.addf %43, %35 : vector<2x8x8xf32>
    %cst_23 = arith.constant dense<0xFF800000> : vector<2x8xf32>
    %45 = vector.multi_reduction <maximumf>, %44, %cst_23 [2] : vector<2x8x8xf32> to vector<2x8xf32>
    %46 = vector.shape_cast %45 : vector<2x8xf32> to vector<2x8x1xf32>
    %47 = vector.broadcast %46 : vector<2x8x1xf32> to vector<2x8x8xf32>
    %48 = arith.subf %44, %47 : vector<2x8x8xf32>
    %49 = math.exp %48 : vector<2x8x8xf32>
    %cst_24 = arith.constant dense<0.000000e+00> : vector<2x8xf32>
    %50 = vector.multi_reduction <add>, %49, %cst_24 [2] : vector<2x8x8xf32> to vector<2x8xf32>
    %51 = vector.shape_cast %50 : vector<2x8xf32> to vector<2x8x1xf32>
    %52 = tpu.reciprocal %51 : vector<2x8x1xf32> -> vector<2x8x1xf32>
    %53 = vector.broadcast %52 : vector<2x8x1xf32> to vector<2x8x8xf32>
    %54 = arith.mulf %49, %53 : vector<2x8x8xf32>
    %c0_25 = arith.constant 0 : index
    %c0_26 = arith.constant 0 : index
    %c0_27 = arith.constant 0 : index
    %55 = vector.load %arg17[%c0_25, %c0_26, %c0_27] : memref<2x8x128xf32, #tpu.memory_space<vmem>>, vector<2x8x8xf32>
    %56 = arith.addf %55, %54 : vector<2x8x8xf32>
    %c0_28 = arith.constant 0 : index
    %c0_29 = arith.constant 0 : index
    %c0_30 = arith.constant 0 : index
    %57 = vector.load %arg17[%c0_28, %c0_29, %c0_30] : memref<2x8x128xf32, #tpu.memory_space<vmem>>, vector<2x8x8xf32>
    tpu.vector_store %arg17[%c0_28, %c0_29, %c0_30], %56 {strides = array<i32>} : memref<2x8x128xf32, #tpu.memory_space<vmem>>, vector<2x8x8xf32>,
    %58 = arith.truncf %54 : vector<2x8x8xf32> to vector<2x8x8xbf16>
    "tpu.trace_start"() <{level = 10 : i32, message = "blm,bmd->bld"}> : () -> ()
    %cst_31 = arith.constant dense<0.000000e+00> : vector<2x8x8xf32>
    %59 = tpu.matmul %58, %42, %cst_31 {dimension_numbers = #tpu.dot_dimension_numbers<[2], [1], [1], [2], [0, 0, 0, 1, 1, 2], [0], [0]>} : vector<2x8x8xbf16>, vector<2x8x8xbf16>, vector<2x8x8xf32> -> vector<2x8x8xf32>
    "tpu.trace_stop"() : () -> ()
    %60 = vector.shape_cast %59 : vector<2x8x8xf32> to vector<16x8xf32>
    %61 = arith.truncf %60 : vector<16x8xf32> to vector<16x8xbf16>
    %c0_32 = arith.constant 0 : index
    %c0_33 = arith.constant 0 : index
    %62 = vector.load %arg5[%c0_32, %c0_33] : memref<32x32xbf16, #tpu.memory_space<vmem>>, vector<8x32xbf16>
    %cst_34 = arith.constant dense<0.000000e+00> : vector<16x32xf32>
    %63 = tpu.matmul %61, %62, %cst_34 {dimension_numbers = #tpu.dot_dimension_numbers<[1], [0], [0], [1], [0, 0, 1, 1], [], []>} : vector<16x8xbf16>, vector<8x32xbf16>, vector<16x32xf32> -> vector<16x32xf32>
    %64 = arith.addf %36, %63 : vector<16x32xf32>
    %65 = vector.extract_strided_slice %30 {offsets = [0, 0, 8], sizes = [2, 8, 8], strides = [1, 1, 1]} : vector<2x8x96xf32> to vector<2x8x8xf32>
    %66 = arith.truncf %65 : vector<2x8x8xf32> to vector<2x8x8xbf16>
    %67 = vector.extract_strided_slice %30 {offsets = [0, 0, 40], sizes = [2, 8, 8], strides = [1, 1, 1]} : vector<2x8x96xf32> to vector<2x8x8xf32>
    %68 = arith.truncf %67 : vector<2x8x8xf32> to vector<2x8x8xbf16>
    %69 = vector.extract_strided_slice %30 {offsets = [0, 0, 72], sizes = [2, 8, 8], strides = [1, 1, 1]} : vector<2x8x96xf32> to vector<2x8x8xf32>
    %70 = arith.truncf %69 : vector<2x8x8xf32> to vector<2x8x8xbf16>
    "tpu.trace_start"() <{level = 10 : i32, message = "bld,bmd->blm"}> : () -> ()
    %cst_35 = arith.constant dense<0.000000e+00> : vector<2x8x8xf32>
    %71 = tpu.matmul %66, %68, %cst_35 {dimension_numbers = #tpu.dot_dimension_numbers<[2], [2], [1], [1], [0, 0, 0, 1, 1, 1], [0], [0]>} : vector<2x8x8xbf16>, vector<2x8x8xbf16>, vector<2x8x8xf32> -> vector<2x8x8xf32>
    "tpu.trace_stop"() : () -> ()
    %72 = arith.addf %71, %35 : vector<2x8x8xf32>
    %cst_36 = arith.constant dense<0xFF800000> : vector<2x8xf32>
    %73 = vector.multi_reduction <maximumf>, %72, %cst_36 [2] : vector<2x8x8xf32> to vector<2x8xf32>
    %74 = vector.shape_cast %73 : vector<2x8xf32> to vector<2x8x1xf32>
    %75 = vector.broadcast %74 : vector<2x8x1xf32> to vector<2x8x8xf32>
    %76 = arith.subf %72, %75 : vector<2x8x8xf32>
    %77 = math.exp %76 : vector<2x8x8xf32>
    %cst_37 = arith.constant dense<0.000000e+00> : vector<2x8xf32>
    %78 = vector.multi_reduction <add>, %77, %cst_37 [2] : vector<2x8x8xf32> to vector<2x8xf32>
    %79 = vector.shape_cast %78 : vector<2x8xf32> to vector<2x8x1xf32>
    %80 = tpu.reciprocal %79 : vector<2x8x1xf32> -> vector<2x8x1xf32>
    %81 = vector.broadcast %80 : vector<2x8x1xf32> to vector<2x8x8xf32>
    %82 = arith.mulf %77, %81 : vector<2x8x8xf32>
    %c0_38 = arith.constant 0 : index
    %c0_39 = arith.constant 0 : index
    %c0_40 = arith.constant 0 : index
    %83 = vector.load %arg17[%c0_38, %c0_39, %c0_40] : memref<2x8x128xf32, #tpu.memory_space<vmem>>, vector<2x8x8xf32>
    %84 = arith.addf %83, %82 : vector<2x8x8xf32>
    %c0_41 = arith.constant 0 : index
    %c0_42 = arith.constant 0 : index
    %c0_43 = arith.constant 0 : index
    %85 = vector.load %arg17[%c0_41, %c0_42, %c0_43] : memref<2x8x128xf32, #tpu.memory_space<vmem>>, vector<2x8x8xf32>
    tpu.vector_store %arg17[%c0_41, %c0_42, %c0_43], %84 {strides = array<i32>} : memref<2x8x128xf32, #tpu.memory_space<vmem>>, vector<2x8x8xf32>,
    %86 = arith.truncf %82 : vector<2x8x8xf32> to vector<2x8x8xbf16>
    "tpu.trace_start"() <{level = 10 : i32, message = "blm,bmd->bld"}> : () -> ()
    %cst_44 = arith.constant dense<0.000000e+00> : vector<2x8x8xf32>
    %87 = tpu.matmul %86, %70, %cst_44 {dimension_numbers = #tpu.dot_dimension_numbers<[2], [1], [1], [2], [0, 0, 0, 1, 1, 2], [0], [0]>} : vector<2x8x8xbf16>, vector<2x8x8xbf16>, vector<2x8x8xf32> -> vector<2x8x8xf32>
    "tpu.trace_stop"() : () -> ()
    %88 = vector.shape_cast %87 : vector<2x8x8xf32> to vector<16x8xf32>
    %89 = arith.truncf %88 : vector<16x8xf32> to vector<16x8xbf16>
    %c8 = arith.constant 8 : index
    %c0_45 = arith.constant 0 : index
    %90 = vector.load %arg5[%c8, %c0_45] : memref<32x32xbf16, #tpu.memory_space<vmem>>, vector<8x32xbf16>
    %cst_46 = arith.constant dense<0.000000e+00> : vector<16x32xf32>
    %91 = tpu.matmul %89, %90, %cst_46 {dimension_numbers = #tpu.dot_dimension_numbers<[1], [0], [0], [1], [0, 0, 1, 1], [], []>} : vector<16x8xbf16>, vector<8x32xbf16>, vector<16x32xf32> -> vector<16x32xf32>
    %92 = arith.addf %64, %91 : vector<16x32xf32>
    %93 = vector.extract_strided_slice %30 {offsets = [0, 0, 16], sizes = [2, 8, 8], strides = [1, 1, 1]} : vector<2x8x96xf32> to vector<2x8x8xf32>
    %94 = arith.truncf %93 : vector<2x8x8xf32> to vector<2x8x8xbf16>
    %95 = vector.extract_strided_slice %30 {offsets = [0, 0, 48], sizes = [2, 8, 8], strides = [1, 1, 1]} : vector<2x8x96xf32> to vector<2x8x8xf32>
    %96 = arith.truncf %95 : vector<2x8x8xf32> to vector<2x8x8xbf16>
    %97 = vector.extract_strided_slice %30 {offsets = [0, 0, 80], sizes = [2, 8, 8], strides = [1, 1, 1]} : vector<2x8x96xf32> to vector<2x8x8xf32>
    %98 = arith.truncf %97 : vector<2x8x8xf32> to vector<2x8x8xbf16>
    "tpu.trace_start"() <{level = 10 : i32, message = "bld,bmd->blm"}> : () -> ()
    %cst_47 = arith.constant dense<0.000000e+00> : vector<2x8x8xf32>
    %99 = tpu.matmul %94, %96, %cst_47 {dimension_numbers = #tpu.dot_dimension_numbers<[2], [2], [1], [1], [0, 0, 0, 1, 1, 1], [0], [0]>} : vector<2x8x8xbf16>, vector<2x8x8xbf16>, vector<2x8x8xf32> -> vector<2x8x8xf32>
    "tpu.trace_stop"() : () -> ()
    %100 = arith.addf %99, %35 : vector<2x8x8xf32>
    %cst_48 = arith.constant dense<0xFF800000> : vector<2x8xf32>
    %101 = vector.multi_reduction <maximumf>, %100, %cst_48 [2] : vector<2x8x8xf32> to vector<2x8xf32>
    %102 = vector.shape_cast %101 : vector<2x8xf32> to vector<2x8x1xf32>
    %103 = vector.broadcast %102 : vector<2x8x1xf32> to vector<2x8x8xf32>
    %104 = arith.subf %100, %103 : vector<2x8x8xf32>
    %105 = math.exp %104 : vector<2x8x8xf32>
    %cst_49 = arith.constant dense<0.000000e+00> : vector<2x8xf32>
    %106 = vector.multi_reduction <add>, %105, %cst_49 [2] : vector<2x8x8xf32> to vector<2x8xf32>
    %107 = vector.shape_cast %106 : vector<2x8xf32> to vector<2x8x1xf32>
    %108 = tpu.reciprocal %107 : vector<2x8x1xf32> -> vector<2x8x1xf32>
    %109 = vector.broadcast %108 : vector<2x8x1xf32> to vector<2x8x8xf32>
    %110 = arith.mulf %105, %109 : vector<2x8x8xf32>
    %c0_50 = arith.constant 0 : index
    %c0_51 = arith.constant 0 : index
    %c0_52 = arith.constant 0 : index
    %111 = vector.load %arg17[%c0_50, %c0_51, %c0_52] : memref<2x8x128xf32, #tpu.memory_space<vmem>>, vector<2x8x8xf32>
    %112 = arith.addf %111, %110 : vector<2x8x8xf32>
    %c0_53 = arith.constant 0 : index
    %c0_54 = arith.constant 0 : index
    %c0_55 = arith.constant 0 : index
    %113 = vector.load %arg17[%c0_53, %c0_54, %c0_55] : memref<2x8x128xf32, #tpu.memory_space<vmem>>, vector<2x8x8xf32>
    tpu.vector_store %arg17[%c0_53, %c0_54, %c0_55], %112 {strides = array<i32>} : memref<2x8x128xf32, #tpu.memory_space<vmem>>, vector<2x8x8xf32>,
    %114 = arith.truncf %110 : vector<2x8x8xf32> to vector<2x8x8xbf16>
    "tpu.trace_start"() <{level = 10 : i32, message = "blm,bmd->bld"}> : () -> ()
    %cst_56 = arith.constant dense<0.000000e+00> : vector<2x8x8xf32>
    %115 = tpu.matmul %114, %98, %cst_56 {dimension_numbers = #tpu.dot_dimension_numbers<[2], [1], [1], [2], [0, 0, 0, 1, 1, 2], [0], [0]>} : vector<2x8x8xbf16>, vector<2x8x8xbf16>, vector<2x8x8xf32> -> vector<2x8x8xf32>
    "tpu.trace_stop"() : () -> ()
    %116 = vector.shape_cast %115 : vector<2x8x8xf32> to vector<16x8xf32>
    %117 = arith.truncf %116 : vector<16x8xf32> to vector<16x8xbf16>
    %c16 = arith.constant 16 : index
    %c0_57 = arith.constant 0 : index
    %118 = vector.load %arg5[%c16, %c0_57] : memref<32x32xbf16, #tpu.memory_space<vmem>>, vector<8x32xbf16>
    %cst_58 = arith.constant dense<0.000000e+00> : vector<16x32xf32>
    %119 = tpu.matmul %117, %118, %cst_58 {dimension_numbers = #tpu.dot_dimension_numbers<[1], [0], [0], [1], [0, 0, 1, 1], [], []>} : vector<16x8xbf16>, vector<8x32xbf16>, vector<16x32xf32> -> vector<16x32xf32>
    %120 = arith.addf %92, %119 : vector<16x32xf32>
    %121 = vector.extract_strided_slice %30 {offsets = [0, 0, 24], sizes = [2, 8, 8], strides = [1, 1, 1]} : vector<2x8x96xf32> to vector<2x8x8xf32>
    %122 = arith.truncf %121 : vector<2x8x8xf32> to vector<2x8x8xbf16>
    %123 = vector.extract_strided_slice %30 {offsets = [0, 0, 56], sizes = [2, 8, 8], strides = [1, 1, 1]} : vector<2x8x96xf32> to vector<2x8x8xf32>
    %124 = arith.truncf %123 : vector<2x8x8xf32> to vector<2x8x8xbf16>
    %125 = vector.extract_strided_slice %30 {offsets = [0, 0, 88], sizes = [2, 8, 8], strides = [1, 1, 1]} : vector<2x8x96xf32> to vector<2x8x8xf32>
    %126 = arith.truncf %125 : vector<2x8x8xf32> to vector<2x8x8xbf16>
    "tpu.trace_start"() <{level = 10 : i32, message = "bld,bmd->blm"}> : () -> ()
    %cst_59 = arith.constant dense<0.000000e+00> : vector<2x8x8xf32>
    %127 = tpu.matmul %122, %124, %cst_59 {dimension_numbers = #tpu.dot_dimension_numbers<[2], [2], [1], [1], [0, 0, 0, 1, 1, 1], [0], [0]>} : vector<2x8x8xbf16>, vector<2x8x8xbf16>, vector<2x8x8xf32> -> vector<2x8x8xf32>
    "tpu.trace_stop"() : () -> ()
    %128 = arith.addf %127, %35 : vector<2x8x8xf32>
    %cst_60 = arith.constant dense<0xFF800000> : vector<2x8xf32>
    %129 = vector.multi_reduction <maximumf>, %128, %cst_60 [2] : vector<2x8x8xf32> to vector<2x8xf32>
    %130 = vector.shape_cast %129 : vector<2x8xf32> to vector<2x8x1xf32>
    %131 = vector.broadcast %130 : vector<2x8x1xf32> to vector<2x8x8xf32>
    %132 = arith.subf %128, %131 : vector<2x8x8xf32>
    %133 = math.exp %132 : vector<2x8x8xf32>
    %cst_61 = arith.constant dense<0.000000e+00> : vector<2x8xf32>
    %134 = vector.multi_reduction <add>, %133, %cst_61 [2] : vector<2x8x8xf32> to vector<2x8xf32>
    %135 = vector.shape_cast %134 : vector<2x8xf32> to vector<2x8x1xf32>
    %136 = tpu.reciprocal %135 : vector<2x8x1xf32> -> vector<2x8x1xf32>
    %137 = vector.broadcast %136 : vector<2x8x1xf32> to vector<2x8x8xf32>
    %138 = arith.mulf %133, %137 : vector<2x8x8xf32>
    %c0_62 = arith.constant 0 : index
    %c0_63 = arith.constant 0 : index
    %c0_64 = arith.constant 0 : index
    %139 = vector.load %arg17[%c0_62, %c0_63, %c0_64] : memref<2x8x128xf32, #tpu.memory_space<vmem>>, vector<2x8x8xf32>
    %140 = arith.addf %139, %138 : vector<2x8x8xf32>
    %c0_65 = arith.constant 0 : index
    %c0_66 = arith.constant 0 : index
    %c0_67 = arith.constant 0 : index
    %141 = vector.load %arg17[%c0_65, %c0_66, %c0_67] : memref<2x8x128xf32, #tpu.memory_space<vmem>>, vector<2x8x8xf32>
    tpu.vector_store %arg17[%c0_65, %c0_66, %c0_67], %140 {strides = array<i32>} : memref<2x8x128xf32, #tpu.memory_space<vmem>>, vector<2x8x8xf32>,
    %142 = arith.truncf %138 : vector<2x8x8xf32> to vector<2x8x8xbf16>
    "tpu.trace_start"() <{level = 10 : i32, message = "blm,bmd->bld"}> : () -> ()
    %cst_68 = arith.constant dense<0.000000e+00> : vector<2x8x8xf32>
    %143 = tpu.matmul %142, %126, %cst_68 {dimension_numbers = #tpu.dot_dimension_numbers<[2], [1], [1], [2], [0, 0, 0, 1, 1, 2], [0], [0]>} : vector<2x8x8xbf16>, vector<2x8x8xbf16>, vector<2x8x8xf32> -> vector<2x8x8xf32>
    "tpu.trace_stop"() : () -> ()
    %144 = vector.shape_cast %143 : vector<2x8x8xf32> to vector<16x8xf32>
    %145 = arith.truncf %144 : vector<16x8xf32> to vector<16x8xbf16>
    %c24 = arith.constant 24 : index
    %c0_69 = arith.constant 0 : index
    %146 = vector.load %arg5[%c24, %c0_69] : memref<32x32xbf16, #tpu.memory_space<vmem>>, vector<8x32xbf16>
    %cst_70 = arith.constant dense<0.000000e+00> : vector<16x32xf32>
    %147 = tpu.matmul %145, %146, %cst_70 {dimension_numbers = #tpu.dot_dimension_numbers<[1], [0], [0], [1], [0, 0, 1, 1], [], []>} : vector<16x8xbf16>, vector<8x32xbf16>, vector<16x32xf32> -> vector<16x32xf32>
    %148 = arith.addf %120, %147 : vector<16x32xf32>
    %149 = arith.addf %1, %148 : vector<16x32xf32>
    %c0_71 = arith.constant 0 : index
    %c0_72 = arith.constant 0 : index
    %150 = vector.load %arg6[%c0_71, %c0_72] : memref<1x32xf32, #tpu.memory_space<vmem>>, vector<1x32xf32>
    %151 = vector.broadcast %150 : vector<1x32xf32> to vector<16x32xf32>
    %152 = arith.addf %149, %151 : vector<16x32xf32>
    %cst_73 = arith.constant dense<0.000000e+00> : vector<16xf32>
    %153 = vector.multi_reduction <add>, %152, %cst_73 [1] : vector<16x32xf32> to vector<16xf32>
    %154 = vector.shape_cast %153 : vector<16xf32> to vector<16x1xf32>
    %cst_74 = arith.constant 3.200000e+01 : f32
    %155 = vector.broadcast %cst_74 : f32 to vector<16x1xf32>
    %156 = arith.divf %154, %155 : vector<16x1xf32>
    %157 = vector.broadcast %156 : vector<16x1xf32> to vector<16x32xf32>
    %158 = arith.subf %152, %157 : vector<16x32xf32>
    %159 = arith.mulf %158, %158 : vector<16x32xf32>
    %cst_75 = arith.constant dense<0.000000e+00> : vector<16xf32>
    %160 = vector.multi_reduction <add>, %159, %cst_75 [1] : vector<16x32xf32> to vector<16xf32>
    %161 = vector.shape_cast %160 : vector<16xf32> to vector<16x1xf32>
    %cst_76 = arith.constant 3.200000e+01 : f32
    %162 = vector.broadcast %cst_76 : f32 to vector<16x1xf32>
    %163 = arith.divf %161, %162 : vector<16x1xf32>
    %cst_77 = arith.constant 9.99999974E-6 : f32
    %164 = vector.broadcast %cst_77 : f32 to vector<16x1xf32>
    %165 = arith.addf %163, %164 : vector<16x1xf32>
    %166 = math.rsqrt %165 : vector<16x1xf32>
    %167 = vector.broadcast %166 : vector<16x1xf32> to vector<16x32xf32>
    %168 = arith.mulf %158, %167 : vector<16x32xf32>
    %c0_78 = arith.constant 0 : index
    %c0_79 = arith.constant 0 : index
    %169 = vector.load %arg9[%c0_78, %c0_79] : memref<1x32xf32, #tpu.memory_space<vmem>>, vector<1x32xf32>
    %170 = vector.broadcast %169 : vector<1x32xf32> to vector<16x32xf32>
    %171 = arith.mulf %168, %170 : vector<16x32xf32>
    %c0_80 = arith.constant 0 : index
    %c0_81 = arith.constant 0 : index
    %172 = vector.load %arg10[%c0_80, %c0_81] : memref<1x32xf32, #tpu.memory_space<vmem>>, vector<1x32xf32>
    %173 = vector.broadcast %172 : vector<1x32xf32> to vector<16x32xf32>
    %174 = arith.addf %171, %173 : vector<16x32xf32>
    %175 = arith.truncf %174 : vector<16x32xf32> to vector<16x32xbf16>
    %c0_82 = arith.constant 0 : index
    %c0_83 = arith.constant 0 : index
    %176 = vector.load %arg12[%c0_82, %c0_83] : memref<1x128xf32, #tpu.memory_space<vmem>>, vector<1x128xf32>
    %cst_84 = arith.constant 0.000000e+00 : f32
    %177 = vector.broadcast %cst_84 : f32 to vector<16x32xf32>
    %c0_85 = arith.constant 0 : index
    %c0_86 = arith.constant 0 : index
    %178 = vector.load %arg11[%c0_85, %c0_86] : memref<32x128xbf16, #tpu.memory_space<vmem>>, vector<32x128xbf16>
    %cst_87 = arith.constant dense<0.000000e+00> : vector<16x128xf32>
    %179 = tpu.matmul %175, %178, %cst_87 {dimension_numbers = #tpu.dot_dimension_numbers<[1], [0], [0], [1], [0, 0, 1, 1], [], []>} : vector<16x32xbf16>, vector<32x128xbf16>, vector<16x128xf32> -> vector<16x128xf32>
    %180 = vector.broadcast %176 : vector<1x128xf32> to vector<16x128xf32>
    %181 = arith.addf %179, %180 : vector<16x128xf32>
    %cst_88 = arith.constant 1.702000e+00 : f32
    %182 = vector.broadcast %cst_88 : f32 to vector<16x128xf32>
    %183 = arith.mulf %182, %181 : vector<16x128xf32>
    %184 = arith.negf %183 : vector<16x128xf32>
    %185 = math.exp %184 : vector<16x128xf32>
    %cst_89 = arith.constant 1.000000e+00 : f32
    %186 = vector.broadcast %cst_89 : f32 to vector<16x128xf32>
    %187 = arith.addf %186, %185 : vector<16x128xf32>
    %188 = arith.divf %186, %187 : vector<16x128xf32>
    %189 = arith.mulf %181, %188 : vector<16x128xf32>
    %190 = arith.truncf %189 : vector<16x128xf32> to vector<16x128xbf16>
    %c0_90 = arith.constant 0 : index
    %c0_91 = arith.constant 0 : index
    %191 = vector.load %arg13[%c0_90, %c0_91] : memref<128x32xbf16, #tpu.memory_space<vmem>>, vector<128x32xbf16>
    %cst_92 = arith.constant dense<0.000000e+00> : vector<16x32xf32>
    %192 = tpu.matmul %190, %191, %cst_92 {dimension_numbers = #tpu.dot_dimension_numbers<[1], [0], [0], [1], [0, 0, 1, 1], [], []>} : vector<16x128xbf16>, vector<128x32xbf16>, vector<16x32xf32> -> vector<16x32xf32>
    %193 = arith.addf %177, %192 : vector<16x32xf32>
    %194 = arith.addf %152, %193 : vector<16x32xf32>
    %c0_93 = arith.constant 0 : index
    %c0_94 = arith.constant 0 : index
    %195 = vector.load %arg14[%c0_93, %c0_94] : memref<1x32xf32, #tpu.memory_space<vmem>>, vector<1x32xf32>
    %196 = vector.broadcast %195 : vector<1x32xf32> to vector<16x32xf32>
    %197 = arith.addf %194, %196 : vector<16x32xf32>
    %198 = vector.shape_cast %197 : vector<16x32xf32> to vector<2x8x32xf32>
    %c0_95 = arith.constant 0 : index
    %c0_96 = arith.constant 0 : index
    %c0_97 = arith.constant 0 : index
    %199 = vector.load %arg15[%c0_95, %c0_96, %c0_97] : memref<2x8x32xf32, #tpu.memory_space<vmem>>, vector<2x8x32xf32>
    tpu.vector_store %arg15[%c0_95, %c0_96, %c0_97], %198 {strides = array<i32>} : memref<2x8x32xf32, #tpu.memory_space<vmem>>, vector<2x8x32xf32>,
    %c0_98 = arith.constant 0 : index
    %c0_99 = arith.constant 0 : index
    %c0_100 = arith.constant 0 : index
    %200 = vector.load %arg17[%c0_98, %c0_99, %c0_100] : memref<2x8x128xf32, #tpu.memory_space<vmem>>, vector<2x8x128xf32>
    %cst_101 = arith.constant 2.500000e-01 : f32
    %201 = vector.broadcast %cst_101 : f32 to vector<2x8x128xf32>
    %202 = arith.mulf %200, %201 : vector<2x8x128xf32>
    %c0_102 = arith.constant 0 : index
    %c0_103 = arith.constant 0 : index
    %c0_104 = arith.constant 0 : index
    %203 = vector.load %arg16[%c0_102, %c0_103, %c0_104] : memref<2x8x128xf32, #tpu.memory_space<vmem>>, vector<2x8x128xf32>
    tpu.vector_store %arg16[%c0_102, %c0_103, %c0_104], %202 {strides = array<i32>} : memref<2x8x128xf32, #tpu.memory_space<vmem>>, vector<2x8x128xf32>,
    return
  }
  func.func @transform_0(%arg0: i32) -> (i32, i32, i32) {
    %c0_i32 = arith.constant 0 : i32
    %c0_i32_0 = arith.constant 0 : i32
    %c0_i32_1 = arith.constant 0 : i32
    return %arg0, %c0_i32, %c0_i32_0 : i32, i32, i32
  }
  func.func @transform_1(%arg0: i32) -> (i32, i32) {
    %c0_i32 = arith.constant 0 : i32
    %c0_i32_0 = arith.constant 0 : i32
    %c0_i32_1 = arith.constant 0 : i32
    return %c0_i32, %c0_i32_0 : i32, i32
  }
  func.func @transform_2(%arg0: i32) -> (i32, i32) {
    %c0_i32 = arith.constant 0 : i32
    %c0_i32_0 = arith.constant 0 : i32
    %c0_i32_1 = arith.constant 0 : i32
    return %c0_i32, %c0_i32_0 : i32, i32
  }
  func.func @transform_3(%arg0: i32) -> (i32, i32) {
    %c0_i32 = arith.constant 0 : i32
    %c0_i32_0 = arith.constant 0 : i32
    %c0_i32_1 = arith.constant 0 : i32
    return %c0_i32, %c0_i32_0 : i32, i32
  }
  func.func @transform_4(%arg0: i32) -> (i32, i32) {
    %c0_i32 = arith.constant 0 : i32
    %c0_i32_0 = arith.constant 0 : i32
    %c0_i32_1 = arith.constant 0 : i32
    return %c0_i32, %c0_i32_0 : i32, i32
  }
  func.func @transform_5(%arg0: i32) -> (i32, i32) {
    %c0_i32 = arith.constant 0 : i32
    %c0_i32_0 = arith.constant 0 : i32
    %c0_i32_1 = arith.constant 0 : i32
    return %c0_i32, %c0_i32_0 : i32, i32
  }
  func.func @transform_6(%arg0: i32) -> (i32, i32) {
    %c0_i32 = arith.constant 0 : i32
    %c0_i32_0 = arith.constant 0 : i32
    %c0_i32_1 = arith.constant 0 : i32
    return %c0_i32, %c0_i32_0 : i32, i32
  }
  func.func @transform_7(%arg0: i32) -> (i32, i32) {
    %c0_i32 = arith.constant 0 : i32
    %c0_i32_0 = arith.constant 0 : i32
    %c0_i32_1 = arith.constant 0 : i32
    return %c0_i32, %c0_i32_0 : i32, i32
  }
  func.func @transform_8(%arg0: i32) -> (i32, i32) {
    %c0_i32 = arith.constant 0 : i32
    %c0_i32_0 = arith.constant 0 : i32
    %c0_i32_1 = arith.constant 0 : i32
    return %c0_i32, %c0_i32_0 : i32, i32
  }
  func.func @transform_9(%arg0: i32) -> (i32, i32) {
    %c0_i32 = arith.constant 0 : i32
    %c0_i32_0 = arith.constant 0 : i32
    %c0_i32_1 = arith.constant 0 : i32
    return %c0_i32, %c0_i32_0 : i32, i32
  }
  func.func @transform_10(%arg0: i32) -> (i32, i32) {
    %c0_i32 = arith.constant 0 : i32
    %c0_i32_0 = arith.constant 0 : i32
    %c0_i32_1 = arith.constant 0 : i32
    return %c0_i32, %c0_i32_0 : i32, i32
  }
  func.func @transform_11(%arg0: i32) -> (i32, i32) {
    %c0_i32 = arith.constant 0 : i32
    %c0_i32_0 = arith.constant 0 : i32
    %c0_i32_1 = arith.constant 0 : i32
    return %c0_i32, %c0_i32_0 : i32, i32
  }
  func.func @transform_12(%arg0: i32) -> (i32, i32) {
    %c0_i32 = arith.constant 0 : i32
    %c0_i32_0 = arith.constant 0 : i32
    %c0_i32_1 = arith.constant 0 : i32
    return %c0_i32, %c0_i32_0 : i32, i32
  }
  func.func @transform_13(%arg0: i32) -> (i32, i32) {
    %c0_i32 = arith.constant 0 : i32
    %c0_i32_0 = arith.constant 0 : i32
    %c0_i32_1 = arith.constant 0 : i32
    return %c0_i32, %c0_i32_0 : i32, i32
  }
  func.func @transform_14(%arg0: i32) -> (i32, i32, i32) {
    %c0_i32 = arith.constant 0 : i32
    %c0_i32_0 = arith.constant 0 : i32
    %c0_i32_1 = arith.constant 0 : i32
    return %arg0, %c0_i32, %c0_i32_0 : i32, i32, i32
  }
  func.func @transform_15(%arg0: i32) -> (i32, i32, i32) {
    %c0_i32 = arith.constant 0 : i32
    %c0_i32_0 = arith.constant 0 : i32
    %c0_i32_1 = arith.constant 0 : i32
    return %arg0, %c0_i32, %c0_i32_0 : i32, i32, i32
  }
}

</mosaic_0001>

<bundles_post_ra>
// kernel: tpu_custom_call.1
= control target key start
LH: loop header
LB: loop body
LE: loop exit
PB: predicated region body
PF: predicated region fallthrough
CT: control target
= control target key end

     0   :  { %21 = vsyncpa [#allocation4], 0  ;;  %vm54_vm0 = vcmask 261120   ;;  %s1675_s0 = inlined_call_operand.vmem [shape: f32[2,8,32], index: 0, kind: input, shape index: {}]   ;;  %s1676_s1 = inlined_call_operand.vmem [shape: f32[8,8], index: 1, kind: input, shape index: {}]   ;;  %s1677_s2 = inlined_call_operand.vmem [shape: bf16[32,96], index: 2, kind: input, shape index: {}]   ;;  %s1678_s3 = inlined_call_operand.vmem [shape: f32[1,96], index: 3, kind: input, shape index: {}]   ;;  %s1679_s4 = inlined_call_operand.vmem [shape: bf16[32,32], index: 4, kind: input, shape index: {}]   ;;  %s1680_s5 = inlined_call_operand.vmem [shape: f32[1,32], index: 5, kind: input, shape index: {}]   ;;  %s1681_s6 = inlined_call_operand.vmem [shape: f32[1,32], index: 6, kind: input, shape index: {}]   ;;  %s1682_s7 = inlined_call_operand.vmem [shape: f32[1,32], index: 7, kind: input, shape index: {}]   ;;  %s1683_s8 = inlined_call_operand.vmem [shape: f32[1,32], index: 8, kind: input, shape index: {}]   ;;  %s1684_s9 = inlined_call_operand.vmem [shape: f32[1,32], index: 9, kind: input, shape index: {}]   ;;  %s1685_s10 = inlined_call_operand.vmem [shape: bf16[32,128], index: 10, kind: input, shape index: {}]   ;;  %s1686_s11 = inlined_call_operand.vmem [shape: f32[1,128], index: 11, kind: input, shape index: {}]   ;;  %s1687_s12 = inlined_call_operand.vmem [shape: bf16[128,32], index: 12, kind: input, shape index: {}]   ;;  %s1688_s13 = inlined_call_operand.vmem [shape: f32[1,32], index: 13, kind: input, shape index: {}]   ;;  %s1689_s14 = inlined_call_operand.hbm [shape: f32[2,8,32], index: 14, kind: output, shape index: {0}]   ;;  %s1690_s15 = inlined_call_operand.hbm [shape: f32[2,8,128], index: 15, kind: output, shape index: {1}]  }
   0x1   :  { %v52_v0 = vld [vmem:[%s1675_s0] sm:$0xff] }
   0x2   :  { %v55_v1 = vsel %vm54_vm0, %v52_v0, 0.0 }
   0x3   :  { %56 = vadd.xlane.f32.xlu0 %v55_v1 }
   0x4   :  { %22 = vsyncpa [#allocation6], 0  ;;  %v1424_v2 = vld [vmem:[%s1675_s0 + $0x8] sm:$0xff]  ;;  %v1320_v4 = vmov 32.0   ;;  %v1180_v23 = vld [vmem:[%s1677_s2] sm:$0xff]  ;;  %s1324_s16 = smov 56  }
   0x5   :  { %v58_v3 = vsel %vm54_vm0, %v1424_v2, 0.0  ;;  %1217 = vrcp.f32 %v1320_v4  ;;  %v1181_v21 = vld [vmem:[%s1677_s2 + $0x8] sm:$0xff]  ;;  %v1209_v42 = vld [vmem:[%s1681_s6] ss:$0 sm:$0xff]  ;;  %s1321_s6 = smov 96   ;;  %vm166_vm8 = vcmask 64512  }
   0x6   :  { %148 = vmatpush.bf16.msra.mxu0 %v1181_v21  ;;  %v1210_v47 = vld [vmem:[%s1682_s7] ss:$0 sm:$0xff]  ;;  %s1322_s7 = smov 88   ;;  %vm271_vm9 = vcmask 1043456   ;;  %s1325_s19 = smov 80  }
   0x7   :  { %v1211_v52 = vld [vmem:[%s1678_s3] ss:$0 sm:$0xff]  ;;  %s1323_s3 = smov 120   ;;  %s1327_s20 = smov 112  }
   0x8   :  { %s1328_s21 = smov 48   ;;  %s1329_s22 = smov 72  }
   0x9   :  { %s1331_s25 = smov 104   ;;  %s1332_s27 = smov 40  }
   0xa   :  { %149 = vmatpush.bf16.msra.mxu0 %v1180_v23  ;;  %s1334_s18 = smov 128  }
   0xb   :  { %59 = vadd.xlane.f32.xlu0 %v58_v3  ;;  %v1218_v5 = vpop.eup %1217 }
   0xc   :  { %v62_v6 = vmul.f32 32.0, %v1218_v5  ;;  %vm66_vm1 = vweird.f32 %v1218_v5 }
   0xe   :  { %v63_v7 = vsub.f32 1.0, %v62_v6 }
  0x10   :  { %v64_v8 = vmul.f32 %v1218_v5, %v63_v7 }
  0x12   :  { %v65_v9 = vadd.f32 %v1218_v5, %v64_v8 }
  0x14   :  { %v1428_v10 = vsel %vm66_vm1, %v1218_v5, %v65_v9 }
  0x76   :  { %v57_v11 = vpop.xlane.xlu0 %56 }
  0x77   :  { %v68_v12 = vmul.f32 %v1428_v10, %v57_v11 }
  0x79   :  { %v70_v13 = vsub.f32 %v52_v0, %v68_v12 }
  0x7b   :  { %v72_v14 = vmul.f32 %v70_v13, %v70_v13 }
  0x7d   :  { %v74_v15 = vsel %vm54_vm0, %v72_v14, 0.0 }
  0x7e   :  { %75 = vadd.xlane.f32.xlu1 %v74_v15  ;;  %v60_v16 = vpop.xlane.xlu0 %59 }
  0x7f   :  { %v69_v17 = vmul.f32 %v1428_v10, %v60_v16 }
  0x81   :  { %v71_v18 = vsub.f32 %v1424_v2, %v69_v17 }
  0x83   :  { %v73_v19 = vmul.f32 %v71_v18, %v71_v18 }
  0x85   :  { %v77_v20 = vsel %vm54_vm0, %v73_v19, 0.0 }
  0x86   :  { %78 = vadd.xlane.f32.xlu1 %v77_v20 }
  0xf1   :  { %v76_v22 = vpop.xlane.xlu1 %75 }
  0xf2   :  { %v80_v24 = vmul.f32 %v76_v22, %v1428_v10 }
  0xf4   :  { %v82_v25 = vadd.f32 1e-05, %v80_v24 }
  0xf6   :  { %1219 = vrsqrt.f32 %v82_v25  ;;  %vm90_vm3 = vweird.f32 %v82_v25 }
  0xf9   :  { %v79_v26 = vpop.xlane.xlu1 %78 }
  0xfa   :  { %v81_v27 = vmul.f32 %v79_v26, %v1428_v10 }
  0xfc   :  { %v1220_v28 = vpop.eup %1219  ;;  %v83_v29 = vadd.f32 1e-05, %v81_v27 }
  0xfd   :  { %v85_v30 = vmul.f32 %v1220_v28, %v82_v25  ;;  %vm91_vm2 = vweird.f32 %v1220_v28 }
  0xfe   :  { %1221 = vrsqrt.f32 %v83_v29  ;;  %vm92_vm4 = vmor %vm90_vm3, %vm91_vm2  ;;  %vm100_vm6 = vweird.f32 %v83_v29 }
  0xff   :  { %v86_v31 = vmul.f32 %v1220_v28, %v85_v30 }
 0x101   :  { %v87_v32 = vmul.f32 0.5, %v86_v31 }
 0x103   :  { %v88_v33 = vsub.f32 1.5, %v87_v32 }
 0x104   :  { %v1222_v34 = vpop.eup %1221 }
 0x105   :  { %v89_v35 = vmul.f32 %v1220_v28, %v88_v33  ;;  %v95_v36 = vmul.f32 %v1222_v34, %v83_v29  ;;  %vm101_vm5 = vweird.f32 %v1222_v34 }
 0x106   :  { %vm102_vm7 = vmor %vm100_vm6, %vm101_vm5 }
 0x107   :  { %v96_v37 = vmul.f32 %v1222_v34, %v95_v36  ;;  %v93_v38 = vsel %vm92_vm4, %v1220_v28, %v89_v35 }
 0x108   :  { %v104_v41 = vmul.f32 %v93_v38, %v70_v13  ;;  %v1477_v13 = vld [vmem:[%s1676_s1] sm:$0xff]  ;;  %s1326_s1 = smov 64  }
 0x109   :  { %v97_v39 = vmul.f32 0.5, %v96_v37 }
 0x10a   :  { %v110_v46 = vmul.f32 %v1209_v42, %v104_v41 }
 0x10b   :  { %v98_v40 = vsub.f32 1.5, %v97_v39 }
 0x10c   :  { %v116_v49 = vadd.f32 %v1210_v47, %v110_v46 }
 0x10d   :  { %v99_v43 = vmul.f32 %v1222_v34, %v98_v40 }
 0x10f   :  { %v103_v44 = vsel %vm102_vm7, %v1222_v34, %v99_v43 }
 0x110   :  { %v105_v45 = vmul.f32 %v103_v44, %v71_v18 }
 0x112   :  { %v111_v48 = vmul.f32 %v1209_v42, %v105_v45 }
 0x114   :  { %v117_v50 = vadd.f32 %v1210_v47, %v111_v48 }
 0x116   :  { %v118_v51 = vpack.c.bf16 %v117_v50, %v116_v49 }
 0x118   :  { %1116 = vmatmul.msk.bf16.vlgmr.msra.gmra.mxu0 %vm54_vm0, %v118_v51 }
 0x195   :  { %v151_v53 = vpop.f32.mrf.mxu0 }
 0x196   :  { %v152_v54 = vadd.f32 %v1211_v52, %v151_v53 }
 0x198   :  { %v159_v55 = vpack.c.bf16 %v152_v54, %v152_v54 }
 0x19a   :  { %v162_v56 = vunpack.c.l.b16 %v159_v55 }
 0x19c   :  { %v1453_v57 = vpack.c.b16 %v162_v56, %v162_v56 }
 0x19d   :  { %v153_v58 = vpop.f32.mrf.mxu0 }
 0x19e   :  { %v154_v59 = vadd.f32 %v1211_v52, %v153_v58  ;;  %164 = vrot.lane.b32.xlu0 %v1453_v57, %s1321_s6  ;;  %313 = vrot.lane.b32.xlu2 %v1453_v57, %s1322_s7 }
 0x1a0   :  { %v160_v60 = vpack.c.bf16 %v154_v59, %v154_v59 }
 0x1a2   :  { %v187_v61 = vunpack.c.l.b16 %v160_v60 }
 0x1a4   :  { %v1457_v62 = vpack.c.b16 %v187_v61, %v187_v61 }
 0x1a6   :  { %189 = vrot.lane.b32.xlu1 %v1457_v62, %s1321_s6  ;;  %311 = vrot.lane.b32.xlu2 %v1453_v57, %s1323_s3 }
 0x1ae   :  { %413 = vrot.lane.b32.xlu1 %v1453_v57, %s1324_s16  ;;  %336 = vrot.lane.b32.xlu2 %v1457_v62, %s1322_s7 }
 0x1b6   :  { %334 = vrot.lane.b32.xlu2 %v1457_v62, %s1323_s3 }
 0x1f8   :  { %v314_v63 = vpop.permute.xlu2 %313 }
 0x1f9   :  { %v319_v0 = vsel %vm166_vm8, %v314_v63, 0 }
 0x1fa   :  { %328 = vmatpush.bf16.xpose.msrb.mxu0 %v319_v0 }
 0x200   :  { %v312_v1 = vpop.permute.xlu2 %311 }
 0x201   :  { %1121 = vmatmul.msk.bf16.vlgmr.msrb.gmra.mxu0 %vm166_vm8, %v312_v1 }
 0x208   :  { %v337_v3 = vpop.permute.xlu2 %336 }
 0x209   :  { %v342_v4 = vsel %vm166_vm8, %v337_v3, 0 }
 0x20a   :  { %351 = vmatpush.bf16.xpose.msra.mxu1 %v342_v4  ;;  %v1330_v4 = vmov 0.0  }
 0x20b   :  { %156 = vst [vmem:[#allocation2] sm:$0xff] %v1330_v4 }
 0x20c   :  { %157 = vst [vmem:[#allocation2 + $0x8] sm:$0xff] %v1330_v4 }
 0x210   :  { %v165_v5 = vpop.permute.xlu0 %164  ;;  %v335_v6 = vpop.permute.xlu2 %334 }
 0x211   :  { %1122 = vmatmul.msk.bf16.vlgmr.msra.gmra.mxu1 %vm166_vm8, %v335_v6  ;;  %v171_v7 = vsel %vm166_vm8, %v165_v5, 0 }
 0x212   :  { %180 = vmatpush.bf16.xpose.msra.mxu2 %v171_v7 }
 0x218   :  { %v190_v8 = vpop.permute.xlu1 %189 }
 0x219   :  { %1117 = vmatmul.msk.bf16.vlgmr.msra.gmra.mxu2 %vm166_vm8, %v159_v55  ;;  %v195_v9 = vsel %vm166_vm8, %v190_v8, 0 }
 0x21a   :  { %204 = vmatpush.bf16.xpose.msrb.mxu2 %v195_v9 }
 0x220   :  { %v414_v11 = vpop.permute.xlu1 %413 }
 0x221   :  { %v419_v12 = vsel %vm271_vm9, %v414_v11, 0 }
 0x222   :  { %428 = vmatpush.bf16.msra.mxu2 %v419_v12 }
 0x229   :  { %1118 = vmatmul.msk.bf16.vlgmr.msrb.gmra.mxu2 %vm166_vm8, %v160_v60 }
 0x27e   :  { %v330_v14 = vpop.f32.mrf.mxu0 }
 0x27f   :  { %v331_v15 = vadd.f32 %v330_v14, %v1477_v13 }
 0x281   :  { %v357_v16 = vsel %vm166_vm8, %v331_v15, -inf }
 0x282   :  { %358 = vmax.xlane.f32.xlu2 %v357_v16 }
 0x286   :  { %v332_v17 = vpop.f32.mrf.mxu0 }
 0x28e   :  { %v353_v18 = vpop.f32.mrf.mxu1 }
 0x28f   :  { %v354_v28 = vadd.f32 %v353_v18, %v1477_v13 }
 0x291   :  { %v360_v29 = vsel %vm166_vm8, %v354_v28, -inf }
 0x296   :  { %v355_v19 = vpop.f32.mrf.mxu1 }
 0x29a   :  { %499 = vrot.lane.b32.xlu2 %v1453_v57, %s1325_s19 }
 0x29c   :  { %v182_v20 = vpop.f32.mrf.mxu2 }
 0x29d   :  { %v183_v21 = vadd.f32 %v182_v20, %v1477_v13 }
 0x29f   :  { %v210_v22 = vsel %vm166_vm8, %v183_v21, -inf }
 0x2a0   :  { %211 = vmax.xlane.f32.xlu1 %v210_v22 }
 0x2a4   :  { %v184_v23 = vpop.f32.mrf.mxu2 }
 0x2ac   :  { %v206_v24 = vpop.f32.mrf.mxu2 }
 0x2ad   :  { %v207_v25 = vadd.f32 %v206_v24, %v1477_v13 }
 0x2af   :  { %v213_v26 = vsel %vm166_vm8, %v207_v25, -inf }
 0x2b0   :  { %214 = vmax.xlane.f32.xlu1 %v213_v26 }
 0x2b4   :  { %v208_v27 = vpop.f32.mrf.mxu2 }
 0x2c3   :  { %361 = vmax.xlane.f32.xlu2 %v360_v29 }
 0x2db   :  { %288 = vrot.lane.b32.xlu2 %v1457_v62, %s1326_s1 }
 0x2e3   :  { %520 = vrot.lane.b32.xlu2 %v1457_v62, %s1327_s20 }
 0x2f5   :  { %v359_v30 = vpop.xlane.xlu2 %358 }
 0x2f6   :  { %v363_v31 = vsub.f32 %v331_v15, %v359_v30 }
 0x2f8   :  { %v365_v32 = vmul.f32 1.442695, %v363_v31 }
 0x2fa   :  { %1223 = vpow2.f32 %v365_v32 }
 0x2fd   :  { %v500_v33 = vpop.permute.xlu2 %499 }
 0x2fe   :  { %v505_v34 = vsel %vm166_vm8, %v500_v33, 0 }
 0x2ff   :  { %514 = vmatpush.bf16.xpose.msrb.mxu2 %v505_v34 }
 0x300   :  { %v1224_v35 = vpop.eup %1223 }
 0x301   :  { %v369_v36 = vsel %vm166_vm8, %v1224_v35, 0.0 }
 0x302   :  { %370 = vadd.xlane.f32.xlu0 %v369_v36 }
 0x313   :  { %v212_v37 = vpop.xlane.xlu1 %211 }
 0x314   :  { %v216_v42 = vsub.f32 %v183_v21, %v212_v37 }
 0x316   :  { %497 = vrot.lane.b32.xlu0 %v1453_v57, %s1327_s20  ;;  %v218_v44 = vmul.f32 1.442695, %v216_v42  ;;  %s1336_s20 = smov [#allocation3]  }
 0x323   :  { %v215_v38 = vpop.xlane.xlu1 %214 }
 0x324   :  { %v217_v39 = vsub.f32 %v207_v25, %v215_v38 }
 0x326   :  { %v220_v40 = vmul.f32 1.442695, %v217_v39 }
 0x328   :  { %1225 = vpow2.f32 %v220_v40 }
 0x329   :  { %1227 = vpow2.f32 %v218_v44  ;;  %v456_v44 = vld [vmem:[%s1679_s4 + $0x4] sm:$0xf] }
 0x32e   :  { %v1494_v41 = vpop.eup %1225 }
 0x32f   :  { %v225_v43 = vsel %vm166_vm8, %v1494_v41, 0.0  ;;  %v1498_v45 = vpop.eup %1227 }
 0x330   :  { %226 = vadd.xlane.f32.xlu1 %v225_v43  ;;  %v222_v46 = vsel %vm166_vm8, %v1498_v45, 0.0 }
 0x336   :  { %v362_v47 = vpop.xlane.xlu2 %361 }
 0x337   :  { %v364_v48 = vsub.f32 %v354_v28, %v362_v47 }
 0x339   :  { %v367_v49 = vmul.f32 1.442695, %v364_v48 }
 0x33b   :  { %1229 = vpow2.f32 %v367_v49 }
 0x33e   :  { %v289_v22 = vpop.permute.xlu2 %288 }
 0x33f   :  { %v294_v27 = vsel %vm271_vm9, %v289_v22, 0 }
 0x340   :  { %223 = vadd.xlane.f32.xlu0 %v222_v46 }
 0x341   :  { %v1507_v50 = vpop.eup %1229 }
 0x342   :  { %v372_v51 = vsel %vm166_vm8, %v1507_v50, 0.0 }
 0x349   :  { %266 = vrot.lane.b32.xlu1 %v1453_v57, %s1326_s1 }
 0x354   :  { %434 = vrot.lane.b32.xlu0 %v1457_v62, %s1324_s16 }
 0x35c   :  { %522 = vrot.lane.b32.xlu0 %v1457_v62, %s1325_s19 }
 0x373   :  { %373 = vadd.xlane.f32.xlu1 %v372_v51 }
 0x375   :  { %v371_v52 = vpop.xlane.xlu0 %370 }
 0x376   :  { %1231 = vrcp.f32 %v371_v52  ;;  %v386_v56 = vand.u32 2147483648, %v371_v52  ;;  %v384_v59 = vand.u32 2147483647, %v371_v52  ;;  %vm380_vm11 = vweird.f32 %v371_v52 }
 0x378   :  { %v387_v61 = vor.u32 1.1754944e-38, %v386_v56  ;;  %vm385_vm13 = vcmp.eq.f32.partialorder %v384_v59, 8.507059e+37 }
 0x37c   :  { %v1232_v53 = vpop.eup %1231 }
 0x37d   :  { %v376_v54 = vmul.f32 %v1232_v53, %v371_v52  ;;  %vm381_vm10 = vweird.f32 %v1232_v53 }
 0x37e   :  { %vm382_vm12 = vmor %vm380_vm11, %vm381_vm10 }
 0x37f   :  { %v377_v55 = vsub.f32 1.0, %v376_v54 }
 0x381   :  { %v378_v58 = vmul.f32 %v1232_v53, %v377_v55 }
 0x383   :  { %v379_v60 = vadd.f32 %v1232_v53, %v378_v58 }
 0x385   :  { %v383_v63 = vsel %vm382_vm12, %v1232_v53, %v379_v60 }
 0x386   :  { %v388_v0 = vsel %vm385_vm13, %v387_v61, %v383_v63 }
 0x387   :  { %v403_v1 = vmul.f32 %v1224_v35, %v388_v0 }
 0x388   :  { %v498_v5 = vpop.permute.xlu0 %497 }
 0x389   :  { %v411_v3 = vpack.c.bf16 %v403_v1, %v403_v1 }
 0x38b   :  { %1123 = vmatmul.msk.bf16.vlgmr.msra.gmra.mxu2 %vm166_vm8, %v411_v3 }
 0x38c   :  { %599 = vrot.lane.b32.xlu1 %v1453_v57, %s1328_s21 }
 0x394   :  { %667 = vrot.lane.b32.xlu1 %v1453_v57, %s1329_s22 }
 0x39b   :  { %1127 = vmatmul.msk.bf16.vlgmr.msrb.gmra.mxu2 %vm166_vm8, %v498_v5  ;;  %v521_v5 = vpop.permute.xlu2 %520 }
 0x39c   :  { %690 = vrot.lane.b32.xlu1 %v1457_v62, %s1329_s22 }
 0x3a3   :  { %v227_v6 = vpop.xlane.xlu1 %226 }
 0x3a4   :  { %1233 = vrcp.f32 %v227_v6  ;;  %v253_v12 = vand.u32 2147483648, %v227_v6  ;;  %v251_v14 = vand.u32 2147483647, %v227_v6  ;;  %vm247_vm15 = vweird.f32 %v227_v6 }
 0x3a6   :  { %v254_v17 = vor.u32 1.1754944e-38, %v253_v12  ;;  %vm252_vm2 = vcmp.eq.f32.partialorder %v251_v14, 8.507059e+37  ;;  %v310_v12 = vld [vmem:[%s1679_s4] sm:$0xf] }
 0x3a7   :  { %v481_v14 = vsel %vm271_vm9, %v310_v12, 0 }
 0x3a8   :  { %490 = vmatpush.bf16.msrb.mxu1 %v481_v14 }
 0x3aa   :  { %v1234_v7 = vpop.eup %1233 }
 0x3ab   :  { %v243_v8 = vmul.f32 %v1234_v7, %v227_v6  ;;  %vm248_vm14 = vweird.f32 %v1234_v7 }
 0x3ac   :  { %vm249_vm1 = vmor %vm247_vm15, %vm248_vm14 }
 0x3ad   :  { %v244_v9 = vsub.f32 1.0, %v243_v8 }
 0x3af   :  { %v245_v11 = vmul.f32 %v1234_v7, %v244_v9 }
 0x3b1   :  { %v246_v15 = vadd.f32 %v1234_v7, %v245_v11 }
 0x3b3   :  { %v250_v16 = vsel %vm249_vm1, %v1234_v7, %v246_v15  ;;  %v224_v18 = vpop.xlane.xlu0 %223 }
 0x3b4   :  { %1235 = vrcp.f32 %v224_v18  ;;  %v255_v19 = vsel %vm252_vm2, %v254_v17, %v250_v16  ;;  %v239_v28 = vand.u32 2147483648, %v224_v18  ;;  %v237_v30 = vand.u32 2147483647, %v224_v18 }
 0x3b5   :  { %v257_v20 = vmul.f32 %v1494_v41, %v255_v19  ;;  %vm233_vm4 = vweird.f32 %v224_v18 }
 0x3b6   :  { %v240_v32 = vor.u32 1.1754944e-38, %v239_v28  ;;  %vm238_vm6 = vcmp.eq.f32.partialorder %v237_v30, 8.507059e+37 }
 0x3b7   :  { %263 = vst.msk [vmem:[#allocation2 + $0x8] sm:$0xff] %vm166_vm8, %v257_v20  ;;  %v265_v42 = vpack.c.bf16 %v257_v20, %v257_v20 }
 0x3ba   :  { %v1236_v21 = vpop.eup %1235 }
 0x3bb   :  { %v229_v23 = vmul.f32 %v1236_v21, %v224_v18  ;;  %v267_v24 = vpop.permute.xlu1 %266  ;;  %vm234_vm3 = vweird.f32 %v1236_v21 }
 0x3bc   :  { %v273_v25 = vsel %vm271_vm9, %v267_v24, 0  ;;  %vm235_vm5 = vmor %vm233_vm4, %vm234_vm3 }
 0x3bd   :  { %v230_v26 = vsub.f32 1.0, %v229_v23  ;;  %282 = vmatpush.bf16.msra.mxu3 %v273_v25 }
 0x3be   :  { %v406_v60 = vld [vmem:[#allocation2 + $0x8] sm:$0xff] }
 0x3bf   :  { %v231_v29 = vmul.f32 %v1236_v21, %v230_v26 }
 0x3c1   :  { %303 = vmatpush.bf16.msrb.mxu3 %v294_v27  ;;  %v232_v31 = vadd.f32 %v1236_v21, %v231_v29 }
 0x3c3   :  { %v236_v33 = vsel %vm235_vm5, %v1236_v21, %v232_v31 }
 0x3c4   :  { %v241_v34 = vsel %vm238_vm6, %v240_v32, %v236_v33 }
 0x3c5   :  { %v256_v35 = vmul.f32 %v1498_v45, %v241_v34  ;;  %v461_v45 = vsel %vm271_vm9, %v456_v44, 0 }
 0x3c6   :  { %v435_v36 = vpop.permute.xlu0 %434  ;;  %470 = vmatpush.bf16.msra.mxu0 %v461_v45 }
 0x3c7   :  { %v440_v37 = vsel %vm271_vm9, %v435_v36, 0  ;;  %v264_v38 = vpack.c.bf16 %v256_v35, %v256_v35  ;;  %262 = vst.msk [vmem:[#allocation2] sm:$0xff] %vm166_vm8, %v256_v35 }
 0x3c9   :  { %1119 = vmatmul.msk.bf16.vlgmr.msra.gmra.mxu3 %vm166_vm8, %v264_v38 }
 0x3ca   :  { %449 = vmatpush.bf16.msra.mxu3 %v440_v37 }
 0x3ce   :  { %v405_v39 = vld [vmem:[#allocation2] sm:$0xff]  ;;  %v523_v41 = vpop.permute.xlu0 %522 }
 0x3cf   :  { %v407_v40 = vadd.f32 %v405_v39, %v403_v1  ;;  %v528_v43 = vsel %vm166_vm8, %v523_v41, 0 }
 0x3d1   :  { %409 = vst.msk [vmem:[#allocation2] sm:$0xff] %vm166_vm8, %v407_v40 }
 0x3d9   :  { %1120 = vmatmul.msk.bf16.vlgmr.msrb.gmra.mxu3 %vm166_vm8, %v265_v42 }
 0x3da   :  { %537 = vmatpush.bf16.xpose.msrb.mxu3 %v528_v43 }
 0x3e6   :  { %v374_v46 = vpop.xlane.xlu1 %373 }
 0x3e7   :  { %1237 = vrcp.f32 %v374_v46  ;;  %v400_v51 = vand.u32 2147483648, %v374_v46  ;;  %v398_v53 = vand.u32 2147483647, %v374_v46  ;;  %vm394_vm10 = vweird.f32 %v374_v46 }
 0x3e9   :  { %v401_v55 = vor.u32 1.1754944e-38, %v400_v51  ;;  %vm399_vm12 = vcmp.eq.f32.partialorder %v398_v53, 8.507059e+37 }
 0x3ed   :  { %v1238_v47 = vpop.eup %1237 }
 0x3ee   :  { %v390_v48 = vmul.f32 %v1238_v47, %v374_v46  ;;  %vm395_vm7 = vweird.f32 %v1238_v47 }
 0x3ef   :  { %vm396_vm11 = vmor %vm394_vm10, %vm395_vm7 }
 0x3f0   :  { %v391_v49 = vsub.f32 1.0, %v390_v48 }
 0x3f2   :  { %v392_v52 = vmul.f32 %v1238_v47, %v391_v49 }
 0x3f4   :  { %v393_v54 = vadd.f32 %v1238_v47, %v392_v52 }
 0x3f6   :  { %v397_v56 = vsel %vm396_vm11, %v1238_v47, %v393_v54 }
 0x3f7   :  { %v402_v58 = vsel %vm399_vm12, %v401_v55, %v397_v56 }
 0x3f8   :  { %v404_v59 = vmul.f32 %v1507_v50, %v402_v58 }
 0x3fa   :  { %v408_v61 = vadd.f32 %v406_v60, %v404_v59  ;;  %v412_v63 = vpack.c.bf16 %v404_v59, %v404_v59  ;;  %v591_v60 = vld [vmem:[#allocation2] sm:$0xff] }
 0x3fc   :  { %410 = vst.msk [vmem:[#allocation2 + $0x8] sm:$0xff] %vm166_vm8, %v408_v61  ;;  %1124 = vmatmul.msk.bf16.vlgmr.msra.gmra.mxu3 %vm166_vm8, %v412_v63 }
 0x3fe   :  { %v600_v0 = vpop.permute.xlu1 %599 }
 0x3ff   :  { %v605_v1 = vsel %vm271_vm9, %v600_v0, 0 }
 0x400   :  { %614 = vmatpush.bf16.msrb.mxu0 %v605_v1 }
 0x406   :  { %v668_v3 = vpop.permute.xlu1 %667 }
 0x407   :  { %v673_v4 = vsel %vm166_vm8, %v668_v3, 0 }
 0x408   :  { %682 = vmatpush.bf16.xpose.msra.mxu3 %v673_v4 }
 0x40c   :  { %1128 = vmatmul.msk.bf16.vlgmr.msrb.gmra.mxu3 %vm166_vm8, %v521_v5 }
 0x40e   :  { %v430_v6 = vpop.f32.mrf.mxu2  ;;  %v691_v20 = vpop.permute.xlu1 %690 }
 0x40f   :  { %v696_v23 = vsel %vm166_vm8, %v691_v20, 0 }
 0x416   :  { %v432_v50 = vpop.f32.mrf.mxu2 }
 0x41e   :  { %v516_v7 = vpop.f32.mrf.mxu2 }
 0x41f   :  { %v517_v8 = vadd.f32 %v516_v7, %v1477_v13 }
 0x421   :  { %v543_v9 = vsel %vm166_vm8, %v517_v8, -inf }
 0x422   :  { %544 = vmax.xlane.f32.xlu0 %v543_v9 }
 0x426   :  { %v518_v11 = vpop.f32.mrf.mxu2 }
 0x436   :  { %665 = vrot.lane.b32.xlu0 %v1453_v57, %s1331_s25 }
 0x44c   :  { %v284_v15 = vpop.f32.mrf.mxu3 }
 0x454   :  { %v286_v16 = vpop.f32.mrf.mxu3 }
 0x45c   :  { %v305_v17 = vpop.f32.mrf.mxu3 }
 0x45d   :  { %v309_v18 = vpack.c.bf16 %v305_v17, %v284_v15 }
 0x45f   :  { %1126 = vmatmul.msk.bf16.vlgmr.msrb.gmra.mxu1 %vm166_vm8, %v309_v18  ;;  %v592_v18 = vld [vmem:[#allocation2 + $0x8] sm:$0xff] }
 0x464   :  { %v307_v19 = vpop.f32.mrf.mxu3 }
 0x47f   :  { %v451_v21 = vpop.f32.mrf.mxu3 }
 0x480   :  { %v455_v22 = vpack.c.bf16 %v451_v21, %v430_v6 }
 0x482   :  { %1125 = vmatmul.msk.bf16.vlgmr.msra.gmra.mxu0 %vm166_vm8, %v455_v22 }
 0x483   :  { %705 = vmatpush.bf16.xpose.msra.mxu0 %v696_v23 }
 0x487   :  { %v453_v24 = vpop.f32.mrf.mxu3 }
 0x48f   :  { %v539_v25 = vpop.f32.mrf.mxu3 }
 0x490   :  { %v540_v26 = vadd.f32 %v539_v25, %v1477_v13 }
 0x492   :  { %v546_v27 = vsel %vm166_vm8, %v540_v26, -inf }
 0x493   :  { %547 = vmax.xlane.f32.xlu1 %v546_v27 }
 0x495   :  { %v545_v28 = vpop.xlane.xlu0 %544 }
 0x496   :  { %v549_v29 = vsub.f32 %v517_v8, %v545_v28 }
 0x497   :  { %v541_v30 = vpop.f32.mrf.mxu3 }
 0x498   :  { %v551_v31 = vmul.f32 1.442695, %v549_v29 }
 0x49a   :  { %1239 = vpow2.f32 %v551_v31 }
 0x4a0   :  { %v1240_v32 = vpop.eup %1239 }
 0x4a1   :  { %v555_v33 = vsel %vm166_vm8, %v1240_v32, 0.0 }
 0x4a2   :  { %556 = vadd.xlane.f32.xlu2 %v555_v33  ;;  %v642_v33 = vld [vmem:[%s1679_s4 + $0x8] sm:$0xf] }
 0x4a8   :  { %v666_v34 = vpop.permute.xlu0 %665 }
 0x4a9   :  { %1132 = vmatmul.msk.bf16.vlgmr.msra.gmra.mxu3 %vm166_vm8, %v666_v34  ;;  %v647_v34 = vsel %vm271_vm9, %v642_v33, 0  ;;  %v1212_v33 = vld [vmem:[%s1680_s5] ss:$0 sm:$0xff]  ;;  %s1091_s5 = sshll.u32 %s1690_s15, 4  ;;  %s1092_s5 = int_to_ptr.hbm [resolvable:$true] %s1091_s5 }
 0x4aa   :  { %656 = vmatpush.bf16.msra.mxu2 %v647_v34  ;;  %v1267_v34 = vld [vmem:[%s1675_s0] sm:$0xff] }
 0x4ba   :  { %688 = vrot.lane.b32.xlu2 %v1457_v62, %s1331_s25 }
 0x4c2   :  { %620 = vrot.lane.b32.xlu2 %v1457_v62, %s1328_s21  ;;  %s1076_s21 = sshll.u32 %s1336_s20, 4  ;;  %s1077_s21 = int_to_ptr.vmem [resolvable:$true] %s1076_s21 }
 0x4dc   :  { %v492_v35 = vpop.f32.mrf.mxu1 }
 0x4ff   :  { %v472_v36 = vpop.f32.mrf.mxu0 }
 0x500   :  { %v1557_v37 = vadd.f32 %v492_v35, %v472_v36  ;;  %v1579_v35 = vpop.f32.mrf.mxu1 }
 0x506   :  { %v548_v38 = vpop.xlane.xlu1 %547 }
 0x507   :  { %v550_v39 = vsub.f32 %v540_v26, %v548_v38  ;;  %v1568_v21 = vpop.f32.mrf.mxu0 }
 0x509   :  { %v553_v40 = vmul.f32 1.442695, %v550_v39 }
 0x50b   :  { %1241 = vpow2.f32 %v553_v40 }
 0x511   :  { %v1242_v41 = vpop.eup %1241 }
 0x512   :  { %v558_v42 = vsel %vm166_vm8, %v1242_v41, 0.0 }
 0x513   :  { %559 = vadd.xlane.f32.xlu0 %v558_v42 }
 0x515   :  { %v557_v43 = vpop.xlane.xlu2 %556 }
 0x516   :  { %1243 = vrcp.f32 %v557_v43  ;;  %v572_v48 = vand.u32 2147483648, %v557_v43  ;;  %v570_v51 = vand.u32 2147483647, %v557_v43  ;;  %vm566_vm14 = vweird.f32 %v557_v43 }
 0x518   :  { %v573_v53 = vor.u32 1.1754944e-38, %v572_v48  ;;  %vm571_vm1 = vcmp.eq.f32.partialorder %v570_v51, 8.507059e+37 }
 0x51c   :  { %v1244_v44 = vpop.eup %1243 }
 0x51d   :  { %v562_v45 = vmul.f32 %v1244_v44, %v557_v43  ;;  %v689_v46 = vpop.permute.xlu2 %688  ;;  %vm567_vm13 = vweird.f32 %v1244_v44 }
 0x51e   :  { %vm568_vm15 = vmor %vm566_vm14, %vm567_vm13 }
 0x51f   :  { %v563_v47 = vsub.f32 1.0, %v562_v45 }
 0x521   :  { %v564_v49 = vmul.f32 %v1244_v44, %v563_v47 }
 0x523   :  { %v565_v52 = vadd.f32 %v1244_v44, %v564_v49 }
 0x525   :  { %v569_v54 = vsel %vm568_vm15, %v1244_v44, %v565_v52  ;;  %v621_v55 = vpop.permute.xlu2 %620 }
 0x526   :  { %v574_v56 = vsel %vm571_vm1, %v573_v53, %v569_v54  ;;  %v626_v58 = vsel %vm271_vm9, %v621_v55, 0 }
 0x527   :  { %v589_v59 = vmul.f32 %v1240_v32, %v574_v56  ;;  %635 = vmatpush.bf16.msra.mxu1 %v626_v58 }
 0x529   :  { %v593_v61 = vadd.f32 %v591_v60, %v589_v59  ;;  %v597_v63 = vpack.c.bf16 %v589_v59, %v589_v59 }
 0x52b   :  { %595 = vst.msk [vmem:[#allocation2] sm:$0xff] %vm166_vm8, %v593_v61  ;;  %1129 = vmatmul.msk.bf16.vlgmr.msrb.gmra.mxu0 %vm166_vm8, %v597_v63 }
 0x52c   :  { %v684_v0 = vpop.f32.mrf.mxu3 }
 0x52d   :  { %v685_v1 = vadd.f32 %v684_v0, %v1477_v13 }
 0x52f   :  { %v711_v3 = vsel %vm166_vm8, %v685_v1, -inf }
 0x530   :  { %712 = vmax.xlane.f32.xlu1 %v711_v3 }
 0x532   :  { %v759_v54 = vld [vmem:[#allocation2] sm:$0xff] }
 0x534   :  { %v686_v4 = vpop.f32.mrf.mxu3 }
 0x53b   :  { %1133 = vmatmul.msk.bf16.vlgmr.msra.gmra.mxu0 %vm166_vm8, %v689_v46 }
 0x586   :  { %v560_v5 = vpop.xlane.xlu0 %559 }
 0x587   :  { %1245 = vrcp.f32 %v560_v5  ;;  %v586_v8 = vand.u32 2147483648, %v560_v5  ;;  %v584_v11 = vand.u32 2147483647, %v560_v5  ;;  %vm580_vm3 = vweird.f32 %v560_v5 }
 0x589   :  { %v587_v14 = vor.u32 1.1754944e-38, %v586_v8  ;;  %vm585_vm5 = vcmp.eq.f32.partialorder %v584_v11, 8.507059e+37 }
 0x58d   :  { %v1246_v6 = vpop.eup %1245 }
 0x58e   :  { %v576_v50 = vmul.f32 %v1246_v6, %v560_v5  ;;  %vm581_vm2 = vweird.f32 %v1246_v6 }
 0x58f   :  { %vm582_vm4 = vmor %vm580_vm3, %vm581_vm2 }
 0x590   :  { %v577_v7 = vsub.f32 1.0, %v576_v50 }
 0x592   :  { %v578_v9 = vmul.f32 %v1246_v6, %v577_v7 }
 0x594   :  { %v579_v12 = vadd.f32 %v1246_v6, %v578_v9 }
 0x596   :  { %v583_v15 = vsel %vm582_vm4, %v1246_v6, %v579_v12 }
 0x597   :  { %v588_v16 = vsel %vm585_vm5, %v587_v14, %v583_v15 }
 0x598   :  { %v590_v17 = vmul.f32 %v1242_v41, %v588_v16 }
 0x59a   :  { %v594_v19 = vadd.f32 %v592_v18, %v590_v17  ;;  %v598_v20 = vpack.c.bf16 %v590_v17, %v590_v17 }
 0x59c   :  { %596 = vst.msk [vmem:[#allocation2 + $0x8] sm:$0xff] %vm166_vm8, %v594_v19  ;;  %1130 = vmatmul.msk.bf16.vlgmr.msra.gmra.mxu1 %vm166_vm8, %v598_v20 }
 0x5a3   :  { %v713_v22 = vpop.xlane.xlu1 %712 }
 0x5a4   :  { %v717_v23 = vsub.f32 %v685_v1, %v713_v22 }
 0x5a6   :  { %v719_v24 = vmul.f32 1.442695, %v717_v23 }
 0x5a8   :  { %1247 = vpow2.f32 %v719_v24  ;;  %v616_v25 = vpop.f32.mrf.mxu0 }
 0x5ae   :  { %v1248_v26 = vpop.eup %1247 }
 0x5af   :  { %v723_v27 = vsel %vm166_vm8, %v1248_v26, 0.0 }
 0x5b0   :  { %724 = vadd.xlane.f32.xlu0 %v723_v27  ;;  %v618_v28 = vpop.f32.mrf.mxu0 }
 0x5b8   :  { %v707_v29 = vpop.f32.mrf.mxu0 }
 0x5b9   :  { %v708_v30 = vadd.f32 %v707_v29, %v1477_v13 }
 0x5bb   :  { %v714_v31 = vsel %vm166_vm8, %v708_v30, -inf }
 0x5bc   :  { %715 = vmax.xlane.f32.xlu2 %v714_v31 }
 0x5c0   :  { %v709_v32 = vpop.f32.mrf.mxu0 }
 0x5c4   :  { %767 = vrot.lane.b32.xlu0 %v1453_v57, %s1332_s27 }
 0x619   :  { %v637_v36 = vpop.f32.mrf.mxu1 }
 0x61a   :  { %v641_v38 = vpack.c.bf16 %v637_v36, %v616_v25  ;;  %v810_v25 = vld [vmem:[%s1679_s4 + $0xc] sm:$0xf] }
 0x61c   :  { %1131 = vmatmul.msk.bf16.vlgmr.msra.gmra.mxu2 %vm166_vm8, %v641_v38  ;;  %v495_v38 = vadd.f32 %v1579_v35, %v1568_v21 }
 0x621   :  { %v639_v13 = vpop.f32.mrf.mxu1 }
 0x623   :  { %v725_v39 = vpop.xlane.xlu0 %724 }
 0x624   :  { %1249 = vrcp.f32 %v725_v39  ;;  %v740_v57 = vand.u32 2147483648, %v725_v39  ;;  %v738_v44 = vand.u32 2147483647, %v725_v39  ;;  %vm734_vm7 = vweird.f32 %v725_v39 }
 0x626   :  { %v741_v48 = vor.u32 1.1754944e-38, %v740_v57  ;;  %vm739_vm11 = vcmp.eq.f32.partialorder %v738_v44, 8.507059e+37 }
 0x62a   :  { %v1250_v40 = vpop.eup %1249 }
 0x62b   :  { %v730_v41 = vmul.f32 %v1250_v40, %v725_v39  ;;  %vm735_vm6 = vweird.f32 %v1250_v40 }
 0x62c   :  { %vm736_vm10 = vmor %vm734_vm7, %vm735_vm6 }
 0x62d   :  { %v731_v42 = vsub.f32 1.0, %v730_v41 }
 0x62f   :  { %v732_v43 = vmul.f32 %v1250_v40, %v731_v42  ;;  %v716_v45 = vpop.xlane.xlu2 %715 }
 0x630   :  { %v718_v46 = vsub.f32 %v708_v30, %v716_v45 }
 0x631   :  { %v733_v47 = vadd.f32 %v1250_v40, %v732_v43 }
 0x632   :  { %v721_v49 = vmul.f32 1.442695, %v718_v46 }
 0x633   :  { %v737_v51 = vsel %vm736_vm10, %v1250_v40, %v733_v47 }
 0x634   :  { %v742_v52 = vsel %vm739_vm11, %v741_v48, %v737_v51  ;;  %1251 = vpow2.f32 %v721_v49 }
 0x635   :  { %v757_v53 = vmul.f32 %v1248_v26, %v742_v52  ;;  %v815_v26 = vsel %vm271_vm9, %v810_v25, 0  ;;  %v1188_v25 = vld [vmem:[%s1687_s12 + $0x20] sm:$0xff] }
 0x636   :  { %v768_v55 = vpop.permute.xlu0 %767  ;;  %824 = vmatpush.bf16.msrb.mxu3 %v815_v26  ;;  %v1215_v26 = vld [vmem:[%s1686_s11] ss:$0 sm:$0xff] }
 0x637   :  { %v761_v56 = vadd.f32 %v759_v54, %v757_v53  ;;  %v773_v58 = vsel %vm271_vm9, %v768_v55, 0  ;;  %v765_v59 = vpack.c.bf16 %v757_v53, %v757_v53  ;;  %v1183_v53 = vld [vmem:[%s1685_s10 + $0x8] sm:$0xff] }
 0x638   :  { %782 = vmatpush.bf16.msrb.mxu1 %v773_v58  ;;  %927 = vmatpush.bf16.msrb.mxu0 %v1183_v53  ;;  %v1182_v58 = vld [vmem:[%s1685_s10] sm:$0xff]  ;;  %s1335_s10 = smov 8  }
 0x639   :  { %763 = vst.msk [vmem:[#allocation2] sm:$0xff] %vm166_vm8, %v761_v56 }
 0x63a   :  { %v1252_v60 = vpop.eup %1251 }
 0x63b   :  { %1134 = vmatmul.msk.bf16.vlgmr.msrb.gmra.mxu1 %vm166_vm8, %v765_v59  ;;  %v726_v61 = vsel %vm166_vm8, %v1252_v60, 0.0 }
 0x63c   :  { %727 = vadd.xlane.f32.xlu1 %v726_v61  ;;  %928 = vmatpush.bf16.msrb.mxu0 %v1182_v58 }
 0x640   :  { %v1066_v63 = vld [vmem:[#allocation2] sm:$0xff] }
 0x641   :  { %v1068_v0 = vmul.f32 0.25, %v1066_v63 }
 0x643   :  { %1070 = vst [vmem:[#allocation5] sm:$0xff] %v1068_v0 }
 0x655   :  { %788 = vrot.lane.b32.xlu1 %v1457_v62, %s1332_s27 }
 0x69f   :  { %v658_v1 = vpop.f32.mrf.mxu2 }
 0x6a0   :  { %v663_v3 = vadd.f32 %v658_v1, %v1557_v37  ;;  %v760_v37 = vld [vmem:[#allocation2 + $0x8] sm:$0xff] }
 0x6a7   :  { %v660_v27 = vpop.f32.mrf.mxu2 }
 0x6a8   :  { %v664_v39 = vadd.f32 %v660_v27, %v495_v38  ;;  %v1187_v27 = vld [vmem:[%s1687_s12 + $0x18] sm:$0xff]  ;;  %v1184_v38 = vld [vmem:[%s1687_s12] sm:$0xff] }
 0x6af   :  { %v728_v4 = vpop.xlane.xlu1 %727 }
 0x6b0   :  { %1253 = vrcp.f32 %v728_v4  ;;  %v754_v8 = vand.u32 2147483648, %v728_v4  ;;  %v752_v11 = vand.u32 2147483647, %v728_v4  ;;  %vm748_vm13 = vweird.f32 %v728_v4 }
 0x6b2   :  { %v755_v14 = vor.u32 1.1754944e-38, %v754_v8  ;;  %vm753_vm15 = vcmp.eq.f32.partialorder %v752_v11, 8.507059e+37 }
 0x6b6   :  { %v1254_v5 = vpop.eup %1253 }
 0x6b7   :  { %v744_v6 = vmul.f32 %v1254_v5, %v728_v4  ;;  %vm749_vm12 = vweird.f32 %v1254_v5 }
 0x6b8   :  { %v784_v50 = vpop.f32.mrf.mxu1  ;;  %vm750_vm14 = vmor %vm748_vm13, %vm749_vm12 }
 0x6b9   :  { %v745_v7 = vsub.f32 1.0, %v744_v6 }
 0x6bb   :  { %v746_v9 = vmul.f32 %v1254_v5, %v745_v7 }
 0x6bd   :  { %v747_v12 = vadd.f32 %v1254_v5, %v746_v9 }
 0x6bf   :  { %v751_v15 = vsel %vm750_vm14, %v1254_v5, %v747_v12 }
 0x6c0   :  { %v756_v62 = vsel %vm753_vm15, %v755_v14, %v751_v15  ;;  %v786_v16 = vpop.f32.mrf.mxu1 }
 0x6c1   :  { %v758_v17 = vmul.f32 %v1252_v60, %v756_v62  ;;  %v1214_v62 = vld [vmem:[%s1684_s9] ss:$0 sm:$0xff] }
 0x6c3   :  { %v762_v18 = vadd.f32 %v760_v37, %v758_v17  ;;  %v766_v22 = vpack.c.bf16 %v758_v17, %v758_v17 }
 0x6c5   :  { %764 = vst.msk [vmem:[#allocation2 + $0x8] sm:$0xff] %vm166_vm8, %v762_v18 }
 0x6c7   :  { %v789_v19 = vpop.permute.xlu1 %788 }
 0x6c8   :  { %v794_v20 = vsel %vm271_vm9, %v789_v19, 0 }
 0x6c9   :  { %803 = vmatpush.bf16.msrb.mxu2 %v794_v20 }
 0x6cc   :  { %1135 = vmatmul.msk.bf16.vlgmr.msrb.gmra.mxu2 %vm166_vm8, %v766_v22  ;;  %v1067_v23 = vld [vmem:[#allocation2 + $0x8] sm:$0xff]  ;;  %v1191_v22 = vld [vmem:[%s1687_s12 + $0x38] sm:$0xff] }
 0x6cd   :  { %v1069_v24 = vmul.f32 0.25, %v1067_v23  ;;  %1042 = vmatpush.bf16.msra.mxu1 %v1191_v22  ;;  %v1190_v23 = vld [vmem:[%s1687_s12 + $0x30] sm:$0xff] }
 0x6cf   :  { %1071 = vst [vmem:[#allocation5 + $0x8] sm:$0xff] %v1069_v24  ;;  %v1189_v24 = vld [vmem:[%s1687_s12 + $0x28] sm:$0xff] }
 0x6d1   :  { %1043 = vmatpush.bf16.msra.mxu1 %v1190_v23 }
 0x6d5   :  { %1044 = vmatpush.bf16.msra.mxu1 %v1189_v24 }
 0x6d9   :  { %1045 = vmatpush.bf16.msra.mxu1 %v1188_v25 }
 0x6dd   :  { %1046 = vmatpush.bf16.msra.mxu1 %v1187_v27 }
 0x74f   :  { %v805_v28 = vpop.f32.mrf.mxu2 }
 0x750   :  { %v809_v29 = vpack.c.bf16 %v805_v28, %v784_v50 }
 0x752   :  { %1136 = vmatmul.msk.bf16.vlgmr.msrb.gmra.mxu3 %vm166_vm8, %v809_v29 }
 0x757   :  { %v807_v30 = vpop.f32.mrf.mxu2 }
 0x758   :  { %v1186_v30 = vld [vmem:[%s1687_s12 + $0x10] sm:$0xff] }
 0x759   :  { %1047 = vmatpush.bf16.msra.mxu1 %v1186_v30 }
 0x7d5   :  { %v826_v31 = vpop.f32.mrf.mxu3 }
 0x7d6   :  { %v831_v32 = vadd.f32 %v826_v31, %v663_v3 }
 0x7d8   :  { %v833_v36 = vadd.f32 %v1267_v34, %v831_v32 }
 0x7da   :  { %v1605_v13 = vadd.f32 %v1212_v33, %v833_v36 }
 0x7dc   :  { %v841_v40 = vsel %vm54_vm0, %v1605_v13, 0.0 }
 0x7dd   :  { %842 = vadd.xlane.f32.xlu2 %v841_v40  ;;  %v828_v41 = vpop.f32.mrf.mxu3 }
 0x7de   :  { %v832_v42 = vadd.f32 %v828_v41, %v664_v39 }
 0x7e0   :  { %v834_v57 = vadd.f32 %v832_v42, %v1424_v2 }
 0x7e2   :  { %v1610_v43 = vadd.f32 %v1212_v33, %v834_v57  ;;  %v1185_v33 = vld [vmem:[%s1687_s12 + $0x8] sm:$0xff]  ;;  %s1333_s12 = smov [#allocation5]  }
 0x7e3   :  { %1048 = vmatpush.bf16.msra.mxu1 %v1185_v33  ;;  %s1089_s17 = sshll.u32 %s1333_s12, 4  ;;  %s1090_s17 = int_to_ptr.vmem [resolvable:$true] %s1089_s17 }
 0x7e4   :  { %v844_v44 = vsel %vm54_vm0, %v1610_v43, 0.0  ;;  %1097 = dma.vmem_to_hbm [thread:$0]  %s1090_s17, 256, %s1092_s5, [#allocation6], %s1334_s18, %s1334_s18, %s1335_s10  }
 0x7e5   :  { %845 = vadd.xlane.f32.xlu2 %v844_v44 }
 0x7e7   :  { %1049 = vmatpush.bf16.msra.mxu1 %v1184_v38 }
 0x850   :  { %v843_v45 = vpop.xlane.xlu2 %842 }
 0x851   :  { %v847_v21 = vmul.f32 %v843_v45, %v1428_v10 }
 0x853   :  { %v849_v35 = vsub.f32 %v1605_v13, %v847_v21 }
 0x855   :  { %v851_v46 = vmul.f32 %v849_v35, %v849_v35 }
 0x857   :  { %v853_v47 = vsel %vm54_vm0, %v851_v46, 0.0 }
 0x858   :  { %854 = vadd.xlane.f32.xlu1 %v853_v47  ;;  %v846_v48 = vpop.xlane.xlu2 %845 }
 0x859   :  { %v848_v49 = vmul.f32 %v846_v48, %v1428_v10 }
 0x85b   :  { %v850_v2 = vsub.f32 %v1610_v43, %v848_v49 }
 0x85d   :  { %v852_v51 = vmul.f32 %v850_v2, %v850_v2 }
 0x85f   :  { %v856_v52 = vsel %vm54_vm0, %v852_v51, 0.0 }
 0x860   :  { %857 = vadd.xlane.f32.xlu0 %v856_v52 }
 0x8cb   :  { %v855_v54 = vpop.xlane.xlu1 %854 }
 0x8cc   :  { %v859_v55 = vmul.f32 %v855_v54, %v1428_v10 }
 0x8ce   :  { %v861_v56 = vadd.f32 1e-05, %v859_v55 }
 0x8d0   :  { %1255 = vrsqrt.f32 %v861_v56  ;;  %vm869_vm9 = vweird.f32 %v861_v56 }
 0x8d3   :  { %v858_v59 = vpop.xlane.xlu0 %857 }
 0x8d4   :  { %v860_v60 = vmul.f32 %v858_v59, %v1428_v10  ;;  %v1213_v10 = vld [vmem:[%s1683_s8] ss:$0 sm:$0xff]  ;;  %s1078_s8 = sshll.u32 %s1689_s14, 4  ;;  %s1079_s8 = int_to_ptr.hbm [resolvable:$true] %s1078_s8 }
 0x8d6   :  { %v1256_v61 = vpop.eup %1255  ;;  %v862_v63 = vadd.f32 1e-05, %v860_v60 }
 0x8d7   :  { %v864_v0 = vmul.f32 %v1256_v61, %v861_v56  ;;  %vm870_vm8 = vweird.f32 %v1256_v61 }
 0x8d8   :  { %1257 = vrsqrt.f32 %v862_v63  ;;  %vm871_vm1 = vmor %vm869_vm9, %vm870_vm8  ;;  %vm879_vm3 = vweird.f32 %v862_v63 }
 0x8d9   :  { %v865_v1 = vmul.f32 %v1256_v61, %v864_v0 }
 0x8db   :  { %v866_v3 = vmul.f32 0.5, %v865_v1 }
 0x8dd   :  { %v867_v4 = vsub.f32 1.5, %v866_v3 }
 0x8de   :  { %v1258_v5 = vpop.eup %1257 }
 0x8df   :  { %v868_v6 = vmul.f32 %v1256_v61, %v867_v4  ;;  %v874_v50 = vmul.f32 %v1258_v5, %v862_v63  ;;  %vm880_vm2 = vweird.f32 %v1258_v5 }
 0x8e0   :  { %vm881_vm4 = vmor %vm879_vm3, %vm880_vm2 }
 0x8e1   :  { %v875_v7 = vmul.f32 %v1258_v5, %v874_v50  ;;  %v872_v8 = vsel %vm871_vm1, %v1256_v61, %v868_v6 }
 0x8e2   :  { %v883_v12 = vmul.f32 %v872_v8, %v849_v35 }
 0x8e3   :  { %v876_v9 = vmul.f32 0.5, %v875_v7 }
 0x8e4   :  { %v889_v16 = vmul.f32 %v1213_v10, %v883_v12 }
 0x8e5   :  { %v877_v11 = vsub.f32 1.5, %v876_v9 }
 0x8e6   :  { %v895_v18 = vadd.f32 %v1214_v62, %v889_v16 }
 0x8e7   :  { %v878_v14 = vmul.f32 %v1258_v5, %v877_v11 }
 0x8e9   :  { %v882_v15 = vsel %vm881_vm4, %v1258_v5, %v878_v14  ;;  %v1216_v5 = vld [vmem:[%s1688_s13] ss:$0 sm:$0xff] }
 0x8ea   :  { %v884_v17 = vmul.f32 %v882_v15, %v850_v2 }
 0x8ec   :  { %v890_v37 = vmul.f32 %v1213_v10, %v884_v17 }
 0x8ee   :  { %v896_v19 = vadd.f32 %v1214_v62, %v890_v37 }
 0x8f0   :  { %v897_v20 = vpack.c.bf16 %v896_v19, %v895_v18 }
 0x8f2   :  { %1145 = vmatmul.msk.bf16.vlgmr.msrb.gmra.mxu0 %vm54_vm0, %v897_v20 }
 0x96f   :  { %v930_v28 = vpop.f32.mrf.mxu0 }
 0x970   :  { %v931_v29 = vadd.f32 %v1215_v26, %v930_v28 }
 0x972   :  { %v1146_v31 = vmul.f32 -1.702, %v931_v29 }
 0x974   :  { %v939_v32 = vmul.f32 1.442695, %v1146_v31 }
 0x976   :  { %1259 = vpow2.f32 %v939_v32 }
 0x977   :  { %v932_v34 = vpop.f32.mrf.mxu0 }
 0x978   :  { %v933_v36 = vadd.f32 %v1215_v26, %v932_v34 }
 0x97a   :  { %v1147_v39 = vmul.f32 -1.702, %v933_v36 }
 0x97c   :  { %v1260_v40 = vpop.eup %1259  ;;  %v941_v41 = vmul.f32 1.442695, %v1147_v39 }
 0x97d   :  { %v943_v42 = vadd.f32 1.0, %v1260_v40 }
 0x97e   :  { %1261 = vpow2.f32 %v941_v41 }
 0x97f   :  { %1263 = vrcp.f32 %v943_v42  ;;  %v956_v2 = vand.u32 2147483648, %v943_v42  ;;  %vm950_vm6 = vweird.f32 %v943_v42  ;;  %v954_v51 = vand.u32 2147483647, %v943_v42 }
 0x981   :  { %v957_v58 = vor.u32 1.1754944e-38, %v956_v2  ;;  %vm955_vm11 = vcmp.eq.f32.partialorder %v954_v51, 8.507059e+37 }
 0x984   :  { %v1262_v57 = vpop.eup %1261 }
 0x985   :  { %v1264_v44 = vpop.eup %1263  ;;  %v944_v45 = vadd.f32 1.0, %v1262_v57 }
 0x986   :  { %v946_v21 = vmul.f32 %v1264_v44, %v943_v42  ;;  %vm951_vm5 = vweird.f32 %v1264_v44 }
 0x987   :  { %1265 = vrcp.f32 %v944_v45  ;;  %vm952_vm7 = vmor %vm950_vm6, %vm951_vm5  ;;  %v971_v53 = vand.u32 2147483648, %v944_v45  ;;  %v969_v56 = vand.u32 2147483647, %v944_v45  ;;  %vm965_vm12 = vweird.f32 %v944_v45 }
 0x988   :  { %v947_v35 = vsub.f32 1.0, %v946_v21 }
 0x989   :  { %v972_v61 = vor.u32 1.1754944e-38, %v971_v53  ;;  %vm970_vm14 = vcmp.eq.f32.partialorder %v969_v56, 8.507059e+37 }
 0x98a   :  { %v948_v46 = vmul.f32 %v1264_v44, %v947_v35 }
 0x98c   :  { %v949_v48 = vadd.f32 %v1264_v44, %v948_v46 }
 0x98d   :  { %v1266_v47 = vpop.eup %1265 }
 0x98e   :  { %v961_v49 = vmul.f32 %v1266_v47, %v944_v45  ;;  %v953_v54 = vsel %vm952_vm7, %v1264_v44, %v949_v48  ;;  %vm966_vm10 = vweird.f32 %v1266_v47 }
 0x98f   :  { %v958_v60 = vsel %vm955_vm11, %v957_v58, %v953_v54  ;;  %vm967_vm13 = vmor %vm965_vm12, %vm966_vm10 }
 0x990   :  { %v962_v52 = vsub.f32 1.0, %v961_v49  ;;  %v975_v1 = vmul.f32 %v958_v60, %v931_v29 }
 0x992   :  { %v963_v55 = vmul.f32 %v1266_v47, %v962_v52 }
 0x994   :  { %v964_v59 = vadd.f32 %v1266_v47, %v963_v55 }
 0x996   :  { %v968_v63 = vsel %vm967_vm13, %v1266_v47, %v964_v59 }
 0x997   :  { %v973_v0 = vsel %vm970_vm14, %v972_v61, %v968_v63 }
 0x998   :  { %v976_v3 = vmul.f32 %v973_v0, %v933_v36 }
 0x99a   :  { %v977_v4 = vpack.c.bf16 %v976_v3, %v975_v1 }
 0x99c   :  { %1050 = vmatmul.bf16.vlgmr.msra.gmra.mxu1 %v977_v4 }
 0xa19   :  { %v1051_v6 = vpop.f32.mrf.mxu1 }
 0xa1a   :  { %v1056_v50 = vadd.f32 %v1051_v6, %v1605_v13 }
 0xa1c   :  { %v1062_v7 = vadd.f32 %v1216_v5, %v1056_v50 }
 0xa1e   :  { %1064 = vst.msk [vmem:[#allocation3] sm:$0xff] %vm54_vm0, %v1062_v7 }
 0xa21   :  { %v1053_v8 = vpop.f32.mrf.mxu1 }
 0xa22   :  { %v1057_v9 = vadd.f32 %v1053_v8, %v1610_v43 }
 0xa24   :  { %v1063_v11 = vadd.f32 %v1216_v5, %v1057_v9 }
 0xa26   :  { %1065 = vst.msk [vmem:[#allocation3 + $0x8] sm:$0xff] %vm54_vm0, %v1063_v11 }
 0xa27   :  { %1084 = dma.vmem_to_hbm [thread:$0]  %s1077_s21, 256, %s1079_s8, [#allocation4], %s1334_s18, %s1334_s18, %s1335_s10  }
 0xa28   :  { %1316 = dma.done.wait [#allocation4], 256  }
 0xa29   :  { %1317 = vsyncadd [#allocation4], 4294967040 }
 0xa2a   :  { %1318 = dma.done.wait [#allocation6], 256  }
 0xa2b   :  { %1319 = vsyncadd [#allocation6], 4294967040 }
 0xa2c   :  { %1106 = vsyncpa [#allocation4], 1 }
 0xa2d   :  { %1107 = vsyncpa [#allocation6], 1 }

</bundles_post_ra>
